<compile_context>
chip_gen: v7x
topology: tpu7x:2x2x1
jax: 0.10.0
libtpu: 0.0.40
codegen_flags: <defaults>
</compile_context>

<pallas_src>
import math
from functools import partial

import jax
import jax.numpy as jnp
from jax.experimental import pallas as pl
from jax.experimental.pallas import tpu as pltpu


# ----------------------------------------------------------------------------
# Fused kernel: wide QKV projection + per-head attention + wide out-projection
# ----------------------------------------------------------------------------
def _fused_attention_kernel(xq_ref, xk_ref, xv_ref,
                            wq_ref, bq_ref, wk_ref, bk_ref, wv_ref, bv_ref,
                            wo_ref, bo_ref,
                            out_ref, *rest,
                            n_heads, d_keys, d_values,
                            compute_dtype, output_attention, recip_approx):
    """grid = (B, H): projections at h==0, one head per step, out-proj at h==H-1."""
    H, dk, dv = n_heads, d_keys, d_values
    f32 = jnp.float32
    cdt = compute_dtype
    if output_attention:
        attn_ref, q_scr, k_scr, v_scr, ctx_scr = rest
    else:
        q_scr, k_scr, v_scr, ctx_scr = rest

    h = pl.program_id(1)

    # ---- h == 0: all-head projections, one wide d_model-deep matmul each. ----
    @pl.when(h == 0)
    def _():
        xq = xq_ref[0]                     # (L, d_model), already compute_dtype
        xk = xk_ref[0]                     # (S, d_model)
        xv = xv_ref[0]                     # (S, d_model)
        # 1/sqrt(dk) is pre-folded into Wq/bq; biases are kept in f32 and added
        # to the f32 accumulators.
        q = jnp.dot(xq, wq_ref[...], preferred_element_type=f32) + bq_ref[...]
        k = jnp.dot(xk, wk_ref[...], preferred_element_type=f32) + bk_ref[...]
        v = jnp.dot(xv, wv_ref[...], preferred_element_type=f32) + bv_ref[...]
        # Scatter heads into (H, ., .) scratch once per batch element (static
        # lane slices) so every later grid step addresses its head with a
        # cheap dynamic leading-dim index; also bounds the live range of the
        # wide f32 projection tensors to this branch.
        for hh in range(H):
            q_scr[hh] = q[:, hh * dk:(hh + 1) * dk].astype(cdt)
            k_scr[hh] = k[:, hh * dk:(hh + 1) * dk].astype(cdt)
            v_scr[hh] = v[:, hh * dv:(hh + 1) * dv].astype(cdt)

    # ---- every step: scaled-dot-product attention for head h only. ----
    q_h = q_scr[h]                         # (L, dk)  compute_dtype
    k_h = k_scr[h]                         # (S, dk)
    v_h = v_scr[h]                         # (S, dv)

    # TODO(synk): for very long S, stream over S tiles with online softmax
    # (flash-style) instead of materializing the full (L, S) scores block.
    scores = jnp.dot(q_h, k_h.T, preferred_element_type=f32)        # (L, S) f32
    m = jnp.max(scores, axis=-1, keepdims=True)
    e = jnp.exp(scores - m)
    denom = jnp.sum(e, axis=-1, keepdims=True)
    a = e * pl.reciprocal(denom, approx=recip_approx)                # (L, S) f32

    ctx_scr[h] = jnp.dot(a.astype(cdt), v_h,
                         preferred_element_type=f32).astype(cdt)     # (L, dv)

    if output_attention:
        attn_ref[0, 0] = a.astype(attn_ref.dtype)

    # ---- h == H-1: single wide output projection (contraction depth H*dv). ----
    @pl.when(h == H - 1)
    def _():
        ctx_wide = jnp.concatenate([ctx_scr[hh] for hh in range(H)], axis=-1)
        out = jnp.dot(ctx_wide, wo_ref[...], preferred_element_type=f32) + bo_ref[...]
        out_ref[0] = out.astype(out_ref.dtype)


# ----------------------------------------------------------------------------
# One-time parameter preparation (cast + scale folding), done at "init" time
# ----------------------------------------------------------------------------
def prepare_attention_params(params, n_heads, compute_dtype=jnp.bfloat16):
    """Cast weights to compute_dtype, fold 1/sqrt(dk) into Wq/bq, reshape biases.

    Biases stay f32 (they are added to f32 accumulators; their bytes are
    negligible next to the weight matrices)."""
    H = n_heads
    d_model, hdk = params["Wq"].shape
    hdv = params["Wv"].shape[1]
    dk, dv = hdk // H, hdv // H
    scale = 1.0 / math.sqrt(dk)
    f32 = jnp.float32
    return {
        "Wq": (params["Wq"].astype(f32) * scale).astype(compute_dtype),
        "bq": (params["bq"].astype(f32) * scale).reshape(1, hdk),
        "Wk": params["Wk"].astype(compute_dtype),
        "bk": params["bk"].astype(f32).reshape(1, hdk),
        "Wv": params["Wv"].astype(compute_dtype),
        "bv": params["bv"].astype(f32).reshape(1, hdv),
        "Wout": params["Wout"].astype(compute_dtype),
        "bout": params["bout"].astype(f32).reshape(1, d_model),
        "n_heads": H, "d_keys": dk, "d_values": dv,
        "compute_dtype": compute_dtype,
    }


def _vmem_cap_bytes():
    """Generation-aware ceiling for vmem_limit_bytes (v7x only has 64 MiB)."""
    try:
        cap = int(pltpu.get_tpu_info().vmem_capacity_bytes)
    except Exception:
        cap = 64 * 1024 * 1024             # conservative default (v7x per-core)
    return int(cap * 0.8)                  # ~20% headroom for Mosaic internals


# ----------------------------------------------------------------------------
# Full AttentionLayer forward
# ----------------------------------------------------------------------------
def attention_layer_forward(queries, keys, values, prepared, *, mix=False,
                            output_attention=True,
                            attn_dtype=jnp.bfloat16,
                            recip_approx=True):
    if mix:
        # TODO(synk): mix=True re-interleave not implemented in the fused kernel.
        raise NotImplementedError("mix=True is not supported by the fused kernel")

    H, dk, dv = prepared["n_heads"], prepared["d_keys"], prepared["d_values"]
    cdt = prepared["compute_dtype"]
    B, L, d_model = queries.shape
    S = keys.shape[1]
    out_dtype = queries.dtype

    # NOTE: at real model sizes keep d_model, H*dk, H*dv and S multiples of 128
    # (lane-dense blocks, unmasked stores); the toy sizes in __main__ are for
    # correctness only.

    # Pre-cast activations in the wrapper (halves per-step input DMA for bf16).
    xq = queries.astype(cdt)
    xk = keys.astype(cdt)
    xv = values.astype(cdt)

    kernel = partial(_fused_attention_kernel,
                     n_heads=H, d_keys=dk, d_values=dv,
                     compute_dtype=cdt, output_attention=output_attention,
                     recip_approx=recip_approx)

    scratch_shapes = [
        pltpu.VMEM((H, L, dk), cdt),       # q, per head
        pltpu.VMEM((H, S, dk), cdt),       # k, per head
        pltpu.VMEM((H, S, dv), cdt),       # v, per head
        pltpu.VMEM((H, L, dv), cdt),       # per-head context for wide out-proj
    ]

    # Rough scoped-VMEM estimate (bytes); only raise the compiler limit when the
    # default would be exceeded, and never above this generation's capacity.
    csz = jnp.dtype(cdt).itemsize
    osz = jnp.dtype(out_dtype).itemsize
    asz = jnp.dtype(attn_dtype).itemsize if output_attention else 0
    blocks = ((L + 2 * S) * d_model * csz * 2                        # x (2-buffered)
              + 2 * d_model * (H * dk + H * dv) * csz                # weights
              + 2 * L * d_model * osz                                # out block
              + 2 * L * S * asz)                                     # attn block
    scratch = H * (L * dk + S * dk + S * dv + L * dv) * csz
    inter = (L * H * dk + S * H * dk + S * H * dv                    # f32 projections
             + 3 * L * S + L * dv + L * H * dv + L * d_model) * 4
    est = int((blocks + scratch + inter) * 1.4)

    cp_kwargs = dict(dimension_semantics=("parallel", "arbitrary"))
    if est > 16 * 1024 * 1024:
        cp_kwargs["vmem_limit_bytes"] = min(est, _vmem_cap_bytes())

    def _call(weight_pipeline_mode):
        wkw = ({} if weight_pipeline_mode is None
               else {"pipeline_mode": weight_pipeline_mode})
        x_spec = lambda n: pl.BlockSpec((1, n, d_model), lambda b, h: (b, 0, 0))
        const2 = lambda b, h: (0, 0)
        in_specs = [
            x_spec(L), x_spec(S), x_spec(S),                          # queries/keys/values
            pl.BlockSpec((d_model, H * dk), const2, **wkw),           # Wq (resident)
            pl.BlockSpec((1, H * dk), const2, **wkw),                 # bq
            pl.BlockSpec((d_model, H * dk), const2, **wkw),           # Wk
            pl.BlockSpec((1, H * dk), const2, **wkw),                 # bk
            pl.BlockSpec((d_model, H * dv), const2, **wkw),           # Wv
            pl.BlockSpec((1, H * dv), const2, **wkw),                 # bv
            pl.BlockSpec((H * dv, d_model), const2, **wkw),           # Wout
            pl.BlockSpec((1, d_model), const2, **wkw),                # bout
        ]
        out_shapes = [jax.ShapeDtypeStruct((B, L, d_model), out_dtype)]
        out_specs = [pl.BlockSpec((1, L, d_model), lambda b, h: (b, 0, 0))]
        if output_attention:
            out_shapes.append(jax.ShapeDtypeStruct((B, H, L, S), attn_dtype))
            out_specs.append(pl.BlockSpec((1, 1, L, S), lambda b, h: (b, h, 0, 0)))
        return pl.pallas_call(
            kernel,
            out_shape=tuple(out_shapes),
            grid=(B, H),
            in_specs=in_specs,
            out_specs=tuple(out_specs),
            scratch_shapes=scratch_shapes,
            compiler_params=pltpu.CompilerParams(**cp_kwargs),
        )(xq, xk, xv,
          prepared["Wq"], prepared["bq"], prepared["Wk"], prepared["bk"],
          prepared["Wv"], prepared["bv"], prepared["Wout"], prepared["bout"])

    try:
        # Single-buffer the constant-index weight blocks: their index_map never
        # changes across the grid, so double-buffering them is wasted VMEM.
        outs = _call(pl.Buffered(1))
    except Exception:
        outs = _call(None)   # fall back to default buffering if unsupported

    if output_attention:
        out, attn = outs
    else:
        out, attn = outs[0], None
    return out, attn


# ----------------------------------------------------------------------------
# Pure-JAX (f32) reference for verification
# ----------------------------------------------------------------------------
def reference_forward(queries, keys, values, params, n_heads):
    B, L, d_model = queries.shape
    S = keys.shape[1]
    dk = params["Wq"].shape[1] // n_heads
    dv = params["Wv"].shape[1] // n_heads
    q = (queries @ params["Wq"] + params["bq"]).reshape(B, L, n_heads, dk)
    k = (keys @ params["Wk"] + params["bk"]).reshape(B, S, n_heads, dk)
    v = (values @ params["Wv"] + params["bv"]).reshape(B, S, n_heads, dv)
    scores = jnp.einsum("blhe,bshe->bhls", q, k) / math.sqrt(dk)
    a = jax.nn.softmax(scores, axis=-1)
    out = jnp.einsum("bhls,bshd->blhd", a, v).reshape(B, L, n_heads * dv)
    out = out @ params["Wout"] + params["bout"]
    return out, a


if __name__ == "__main__":
    B, L, S = 2, 8, 8
    d_model, H = 32, 4
    dk = dv = d_model // H

    key = jax.random.PRNGKey(0)
    ks = jax.random.split(key, 11)

    def init(k, shape, fan_in):
        bound = 1.0 / math.sqrt(fan_in)
        return jax.random.uniform(k, shape, jnp.float32, -bound, bound)

    queries = jax.random.normal(ks[0], (B, L, d_model), jnp.float32)
    keys_in = jax.random.normal(ks[1], (B, S, d_model), jnp.float32)
    values_in = jax.random.normal(ks[2], (B, S, d_model), jnp.float32)

    params = {
        "Wq": init(ks[3], (d_model, H * dk), d_model),
        "bq": init(ks[4], (H * dk,), d_model),
        "Wk": init(ks[5], (d_model, H * dk), d_model),
        "bk": init(ks[6], (H * dk,), d_model),
        "Wv": init(ks[7], (d_model, H * dv), d_model),
        "bv": init(ks[8], (H * dv,), d_model),
        "Wout": init(ks[9], (H * dv, d_model), H * dv),
        "bout": init(ks[10], (d_model,), H * dv),
    }

    ref_out, ref_attn = reference_forward(queries, keys_in, values_in, params, H)

    # 1) f32 compute path + exact reciprocal: near-exact match vs reference.
    prep32 = prepare_attention_params(params, H, compute_dtype=jnp.float32)
    out32, attn32 = attention_layer_forward(queries, keys_in, values_in, prep32,
                                            attn_dtype=jnp.float32,
                                            recip_approx=False)
    out32 = jax.block_until_ready(out32)
    attn32 = jax.block_until_ready(attn32)
    assert out32.shape == (B, L, d_model)
    assert attn32.shape == (B, H, L, S)
    assert jnp.allclose(out32, ref_out, atol=1e-4, rtol=1e-4)
    assert jnp.allclose(attn32, ref_attn, atol=1e-4, rtol=1e-4)

    # 2) bf16 performance configuration: bf16 weights/activations, bf16 attn
    #    output, approx reciprocal.
    prep16 = prepare_attention_params(params, H, compute_dtype=jnp.bfloat16)
    out16, attn16 = attention_layer_forward(queries, keys_in, values_in, prep16)
    out16 = jax.block_until_ready(out16)
    attn16 = jax.block_until_ready(attn16)
    assert jnp.allclose(out16, ref_out, atol=3e-2, rtol=3e-2)
    assert jnp.allclose(attn16.astype(jnp.float32), ref_attn, atol=3e-2, rtol=3e-2)

    # 3) output_attention=False path (no attention-weights HBM writeback).
    out_na, attn_na = attention_layer_forward(queries, keys_in, values_in, prep16,
                                              output_attention=False)
    out_na = jax.block_until_ready(out_na)
    assert attn_na is None
    assert jnp.allclose(out_na, ref_out, atol=3e-2, rtol=3e-2)

    print("KERNEL_OK")
</pallas_src>

<mosaic_0001>
module attributes {stable_mosaic.version = 11 : i64} {
  func.func @_fused_attention_kernel(%arg0: i32, %arg1: i32, %arg2: memref<1x8x32xf32, #tpu.memory_space<vmem>>, %arg3: memref<1x8x32xf32, #tpu.memory_space<vmem>>, %arg4: memref<1x8x32xf32, #tpu.memory_space<vmem>>, %arg5: memref<32x32xf32, #tpu.memory_space<vmem>>, %arg6: memref<1x32xf32, #tpu.memory_space<vmem>>, %arg7: memref<32x32xf32, #tpu.memory_space<vmem>>, %arg8: memref<1x32xf32, #tpu.memory_space<vmem>>, %arg9: memref<32x32xf32, #tpu.memory_space<vmem>>, %arg10: memref<1x32xf32, #tpu.memory_space<vmem>>, %arg11: memref<32x32xf32, #tpu.memory_space<vmem>>, %arg12: memref<1x32xf32, #tpu.memory_space<vmem>>, %arg13: memref<1x8x32xf32, #tpu.memory_space<vmem>>, %arg14: memref<1x1x8x8xf32, #tpu.memory_space<vmem>>, %arg15: memref<4x8x8xf32, #tpu.memory_space<vmem>>, %arg16: memref<4x8x8xf32, #tpu.memory_space<vmem>>, %arg17: memref<4x8x8xf32, #tpu.memory_space<vmem>>, %arg18: memref<4x8x8xf32, #tpu.memory_space<vmem>>) attributes {dimension_semantics = [#tpu.dimension_semantics<parallel>, #tpu.dimension_semantics<arbitrary>], iteration_bounds = array<i64: 2, 4>, scalar_prefetch = 0 : i64, scratch_operands = 4 : i64, tpu.core_type = #tpu.core_type<tc>, window_params = [{transform_indices = @transform_0, window_bounds = array<i64: 1, 8, 32>}, {transform_indices = @transform_1, window_bounds = array<i64: 1, 8, 32>}, {transform_indices = @transform_2, window_bounds = array<i64: 1, 8, 32>}, {pipeline_mode = #tpu.pipeline_mode<synchronous>, transform_indices = @transform_3, window_bounds = array<i64: 32, 32>}, {pipeline_mode = #tpu.pipeline_mode<synchronous>, transform_indices = @transform_4, window_bounds = array<i64: 1, 32>}, {pipeline_mode = #tpu.pipeline_mode<synchronous>, transform_indices = @transform_5, window_bounds = array<i64: 32, 32>}, {pipeline_mode = #tpu.pipeline_mode<synchronous>, transform_indices = @transform_6, window_bounds = array<i64: 1, 32>}, {pipeline_mode = #tpu.pipeline_mode<synchronous>, transform_indices = @transform_7, window_bounds = array<i64: 32, 32>}, {pipeline_mode = #tpu.pipeline_mode<synchronous>, transform_indices = @transform_8, window_bounds = array<i64: 1, 32>}, {pipeline_mode = #tpu.pipeline_mode<synchronous>, transform_indices = @transform_9, window_bounds = array<i64: 32, 32>}, {pipeline_mode = #tpu.pipeline_mode<synchronous>, transform_indices = @transform_10, window_bounds = array<i64: 1, 32>}, {transform_indices = @transform_11, window_bounds = array<i64: 1, 8, 32>}, {transform_indices = @transform_12, window_bounds = array<i64: 1, 1, 8, 8>}]} {
    %c0_i32 = arith.constant 0 : i32
    %0 = arith.cmpi eq, %arg1, %c0_i32 : i32
    %1 = arith.extui %0 : i1 to i32
    %c0_i32_0 = arith.constant 0 : i32
    %2 = arith.cmpi ne, %1, %c0_i32_0 : i32
    scf.if %2 {
      %c0_16 = arith.constant 0 : index
      %c0_17 = arith.constant 0 : index
      %c0_18 = arith.constant 0 : index
      %35 = vector.load %arg2[%c0_16, %c0_17, %c0_18] : memref<1x8x32xf32, #tpu.memory_space<vmem>>, vector<1x8x32xf32>
      %36 = vector.shape_cast %35 : vector<1x8x32xf32> to vector<8x32xf32>
      %c0_19 = arith.constant 0 : index
      %c0_20 = arith.constant 0 : index
      %c0_21 = arith.constant 0 : index
      %37 = vector.load %arg3[%c0_19, %c0_20, %c0_21] : memref<1x8x32xf32, #tpu.memory_space<vmem>>, vector<1x8x32xf32>
      %38 = vector.shape_cast %37 : vector<1x8x32xf32> to vector<8x32xf32>
      %c0_22 = arith.constant 0 : index
      %c0_23 = arith.constant 0 : index
      %c0_24 = arith.constant 0 : index
      %39 = vector.load %arg4[%c0_22, %c0_23, %c0_24] : memref<1x8x32xf32, #tpu.memory_space<vmem>>, vector<1x8x32xf32>
      %40 = vector.shape_cast %39 : vector<1x8x32xf32> to vector<8x32xf32>
      %c0_25 = arith.constant 0 : index
      %c0_26 = arith.constant 0 : index
      %41 = vector.load %arg5[%c0_25, %c0_26] : memref<32x32xf32, #tpu.memory_space<vmem>>, vector<32x32xf32>
      %cst_27 = arith.constant dense<0.000000e+00> : vector<8x32xf32>
      %42 = tpu.matmul %36, %41, %cst_27 {dimension_numbers = #tpu.dot_dimension_numbers<[1], [0], [0], [1], [0, 0, 1, 1], [], []>} : vector<8x32xf32>, vector<32x32xf32>, vector<8x32xf32> -> vector<8x32xf32>
      %c0_28 = arith.constant 0 : index
      %c0_29 = arith.constant 0 : index
      %43 = vector.load %arg6[%c0_28, %c0_29] : memref<1x32xf32, #tpu.memory_space<vmem>>, vector<1x32xf32>
      %44 = vector.broadcast %43 : vector<1x32xf32> to vector<8x32xf32>
      %45 = arith.addf %42, %44 : vector<8x32xf32>
      %c0_30 = arith.constant 0 : index
      %c0_31 = arith.constant 0 : index
      %46 = vector.load %arg7[%c0_30, %c0_31] : memref<32x32xf32, #tpu.memory_space<vmem>>, vector<32x32xf32>
      %cst_32 = arith.constant dense<0.000000e+00> : vector<8x32xf32>
      %47 = tpu.matmul %38, %46, %cst_32 {dimension_numbers = #tpu.dot_dimension_numbers<[1], [0], [0], [1], [0, 0, 1, 1], [], []>} : vector<8x32xf32>, vector<32x32xf32>, vector<8x32xf32> -> vector<8x32xf32>
      %c0_33 = arith.constant 0 : index
      %c0_34 = arith.constant 0 : index
      %48 = vector.load %arg8[%c0_33, %c0_34] : memref<1x32xf32, #tpu.memory_space<vmem>>, vector<1x32xf32>
      %49 = vector.broadcast %48 : vector<1x32xf32> to vector<8x32xf32>
      %50 = arith.addf %47, %49 : vector<8x32xf32>
      %c0_35 = arith.constant 0 : index
      %c0_36 = arith.constant 0 : index
      %51 = vector.load %arg9[%c0_35, %c0_36] : memref<32x32xf32, #tpu.memory_space<vmem>>, vector<32x32xf32>
      %cst_37 = arith.constant dense<0.000000e+00> : vector<8x32xf32>
      %52 = tpu.matmul %40, %51, %cst_37 {dimension_numbers = #tpu.dot_dimension_numbers<[1], [0], [0], [1], [0, 0, 1, 1], [], []>} : vector<8x32xf32>, vector<32x32xf32>, vector<8x32xf32> -> vector<8x32xf32>
      %c0_38 = arith.constant 0 : index
      %c0_39 = arith.constant 0 : index
      %53 = vector.load %arg10[%c0_38, %c0_39] : memref<1x32xf32, #tpu.memory_space<vmem>>, vector<1x32xf32>
      %54 = vector.broadcast %53 : vector<1x32xf32> to vector<8x32xf32>
      %55 = arith.addf %52, %54 : vector<8x32xf32>
      %56 = vector.extract_strided_slice %45 {offsets = [0, 0], sizes = [8, 8], strides = [1, 1]} : vector<8x32xf32> to vector<8x8xf32>
      %c0_40 = arith.constant 0 : index
      %c0_41 = arith.constant 0 : index
      %c0_42 = arith.constant 0 : index
      %57 = vector.load %arg15[%c0_40, %c0_41, %c0_42] : memref<4x8x8xf32, #tpu.memory_space<vmem>>, vector<1x8x8xf32>
      %58 = vector.shape_cast %57 : vector<1x8x8xf32> to vector<8x8xf32>
      %59 = vector.shape_cast %56 : vector<8x8xf32> to vector<1x8x8xf32>
      tpu.vector_store %arg15[%c0_40, %c0_41, %c0_42], %59 {strides = array<i32>} : memref<4x8x8xf32, #tpu.memory_space<vmem>>, vector<1x8x8xf32>,
      %60 = vector.extract_strided_slice %50 {offsets = [0, 0], sizes = [8, 8], strides = [1, 1]} : vector<8x32xf32> to vector<8x8xf32>
      %c0_43 = arith.constant 0 : index
      %c0_44 = arith.constant 0 : index
      %c0_45 = arith.constant 0 : index
      %61 = vector.load %arg16[%c0_43, %c0_44, %c0_45] : memref<4x8x8xf32, #tpu.memory_space<vmem>>, vector<1x8x8xf32>
      %62 = vector.shape_cast %61 : vector<1x8x8xf32> to vector<8x8xf32>
      %63 = vector.shape_cast %60 : vector<8x8xf32> to vector<1x8x8xf32>
      tpu.vector_store %arg16[%c0_43, %c0_44, %c0_45], %63 {strides = array<i32>} : memref<4x8x8xf32, #tpu.memory_space<vmem>>, vector<1x8x8xf32>,
      %64 = vector.extract_strided_slice %55 {offsets = [0, 0], sizes = [8, 8], strides = [1, 1]} : vector<8x32xf32> to vector<8x8xf32>
      %c0_46 = arith.constant 0 : index
      %c0_47 = arith.constant 0 : index
      %c0_48 = arith.constant 0 : index
      %65 = vector.load %arg17[%c0_46, %c0_47, %c0_48] : memref<4x8x8xf32, #tpu.memory_space<vmem>>, vector<1x8x8xf32>
      %66 = vector.shape_cast %65 : vector<1x8x8xf32> to vector<8x8xf32>
      %67 = vector.shape_cast %64 : vector<8x8xf32> to vector<1x8x8xf32>
      tpu.vector_store %arg17[%c0_46, %c0_47, %c0_48], %67 {strides = array<i32>} : memref<4x8x8xf32, #tpu.memory_space<vmem>>, vector<1x8x8xf32>,
      %68 = vector.extract_strided_slice %45 {offsets = [0, 8], sizes = [8, 8], strides = [1, 1]} : vector<8x32xf32> to vector<8x8xf32>
      %c1 = arith.constant 1 : index
      %c0_49 = arith.constant 0 : index
      %c0_50 = arith.constant 0 : index
      %69 = vector.load %arg15[%c1, %c0_49, %c0_50] : memref<4x8x8xf32, #tpu.memory_space<vmem>>, vector<1x8x8xf32>
      %70 = vector.shape_cast %69 : vector<1x8x8xf32> to vector<8x8xf32>
      %71 = vector.shape_cast %68 : vector<8x8xf32> to vector<1x8x8xf32>
      tpu.vector_store %arg15[%c1, %c0_49, %c0_50], %71 {strides = array<i32>} : memref<4x8x8xf32, #tpu.memory_space<vmem>>, vector<1x8x8xf32>,
      %72 = vector.extract_strided_slice %50 {offsets = [0, 8], sizes = [8, 8], strides = [1, 1]} : vector<8x32xf32> to vector<8x8xf32>
      %c1_51 = arith.constant 1 : index
      %c0_52 = arith.constant 0 : index
      %c0_53 = arith.constant 0 : index
      %73 = vector.load %arg16[%c1_51, %c0_52, %c0_53] : memref<4x8x8xf32, #tpu.memory_space<vmem>>, vector<1x8x8xf32>
      %74 = vector.shape_cast %73 : vector<1x8x8xf32> to vector<8x8xf32>
      %75 = vector.shape_cast %72 : vector<8x8xf32> to vector<1x8x8xf32>
      tpu.vector_store %arg16[%c1_51, %c0_52, %c0_53], %75 {strides = array<i32>} : memref<4x8x8xf32, #tpu.memory_space<vmem>>, vector<1x8x8xf32>,
      %76 = vector.extract_strided_slice %55 {offsets = [0, 8], sizes = [8, 8], strides = [1, 1]} : vector<8x32xf32> to vector<8x8xf32>
      %c1_54 = arith.constant 1 : index
      %c0_55 = arith.constant 0 : index
      %c0_56 = arith.constant 0 : index
      %77 = vector.load %arg17[%c1_54, %c0_55, %c0_56] : memref<4x8x8xf32, #tpu.memory_space<vmem>>, vector<1x8x8xf32>
      %78 = vector.shape_cast %77 : vector<1x8x8xf32> to vector<8x8xf32>
      %79 = vector.shape_cast %76 : vector<8x8xf32> to vector<1x8x8xf32>
      tpu.vector_store %arg17[%c1_54, %c0_55, %c0_56], %79 {strides = array<i32>} : memref<4x8x8xf32, #tpu.memory_space<vmem>>, vector<1x8x8xf32>,
      %80 = vector.extract_strided_slice %45 {offsets = [0, 16], sizes = [8, 8], strides = [1, 1]} : vector<8x32xf32> to vector<8x8xf32>
      %c2 = arith.constant 2 : index
      %c0_57 = arith.constant 0 : index
      %c0_58 = arith.constant 0 : index
      %81 = vector.load %arg15[%c2, %c0_57, %c0_58] : memref<4x8x8xf32, #tpu.memory_space<vmem>>, vector<1x8x8xf32>
      %82 = vector.shape_cast %81 : vector<1x8x8xf32> to vector<8x8xf32>
      %83 = vector.shape_cast %80 : vector<8x8xf32> to vector<1x8x8xf32>
      tpu.vector_store %arg15[%c2, %c0_57, %c0_58], %83 {strides = array<i32>} : memref<4x8x8xf32, #tpu.memory_space<vmem>>, vector<1x8x8xf32>,
      %84 = vector.extract_strided_slice %50 {offsets = [0, 16], sizes = [8, 8], strides = [1, 1]} : vector<8x32xf32> to vector<8x8xf32>
      %c2_59 = arith.constant 2 : index
      %c0_60 = arith.constant 0 : index
      %c0_61 = arith.constant 0 : index
      %85 = vector.load %arg16[%c2_59, %c0_60, %c0_61] : memref<4x8x8xf32, #tpu.memory_space<vmem>>, vector<1x8x8xf32>
      %86 = vector.shape_cast %85 : vector<1x8x8xf32> to vector<8x8xf32>
      %87 = vector.shape_cast %84 : vector<8x8xf32> to vector<1x8x8xf32>
      tpu.vector_store %arg16[%c2_59, %c0_60, %c0_61], %87 {strides = array<i32>} : memref<4x8x8xf32, #tpu.memory_space<vmem>>, vector<1x8x8xf32>,
      %88 = vector.extract_strided_slice %55 {offsets = [0, 16], sizes = [8, 8], strides = [1, 1]} : vector<8x32xf32> to vector<8x8xf32>
      %c2_62 = arith.constant 2 : index
      %c0_63 = arith.constant 0 : index
      %c0_64 = arith.constant 0 : index
      %89 = vector.load %arg17[%c2_62, %c0_63, %c0_64] : memref<4x8x8xf32, #tpu.memory_space<vmem>>, vector<1x8x8xf32>
      %90 = vector.shape_cast %89 : vector<1x8x8xf32> to vector<8x8xf32>
      %91 = vector.shape_cast %88 : vector<8x8xf32> to vector<1x8x8xf32>
      tpu.vector_store %arg17[%c2_62, %c0_63, %c0_64], %91 {strides = array<i32>} : memref<4x8x8xf32, #tpu.memory_space<vmem>>, vector<1x8x8xf32>,
      %92 = vector.extract_strided_slice %45 {offsets = [0, 24], sizes = [8, 8], strides = [1, 1]} : vector<8x32xf32> to vector<8x8xf32>
      %c3 = arith.constant 3 : index
      %c0_65 = arith.constant 0 : index
      %c0_66 = arith.constant 0 : index
      %93 = vector.load %arg15[%c3, %c0_65, %c0_66] : memref<4x8x8xf32, #tpu.memory_space<vmem>>, vector<1x8x8xf32>
      %94 = vector.shape_cast %93 : vector<1x8x8xf32> to vector<8x8xf32>
      %95 = vector.shape_cast %92 : vector<8x8xf32> to vector<1x8x8xf32>
      tpu.vector_store %arg15[%c3, %c0_65, %c0_66], %95 {strides = array<i32>} : memref<4x8x8xf32, #tpu.memory_space<vmem>>, vector<1x8x8xf32>,
      %96 = vector.extract_strided_slice %50 {offsets = [0, 24], sizes = [8, 8], strides = [1, 1]} : vector<8x32xf32> to vector<8x8xf32>
      %c3_67 = arith.constant 3 : index
      %c0_68 = arith.constant 0 : index
      %c0_69 = arith.constant 0 : index
      %97 = vector.load %arg16[%c3_67, %c0_68, %c0_69] : memref<4x8x8xf32, #tpu.memory_space<vmem>>, vector<1x8x8xf32>
      %98 = vector.shape_cast %97 : vector<1x8x8xf32> to vector<8x8xf32>
      %99 = vector.shape_cast %96 : vector<8x8xf32> to vector<1x8x8xf32>
      tpu.vector_store %arg16[%c3_67, %c0_68, %c0_69], %99 {strides = array<i32>} : memref<4x8x8xf32, #tpu.memory_space<vmem>>, vector<1x8x8xf32>,
      %100 = vector.extract_strided_slice %55 {offsets = [0, 24], sizes = [8, 8], strides = [1, 1]} : vector<8x32xf32> to vector<8x8xf32>
      %c3_70 = arith.constant 3 : index
      %c0_71 = arith.constant 0 : index
      %c0_72 = arith.constant 0 : index
      %101 = vector.load %arg17[%c3_70, %c0_71, %c0_72] : memref<4x8x8xf32, #tpu.memory_space<vmem>>, vector<1x8x8xf32>
      %102 = vector.shape_cast %101 : vector<1x8x8xf32> to vector<8x8xf32>
      %103 = vector.shape_cast %100 : vector<8x8xf32> to vector<1x8x8xf32>
      tpu.vector_store %arg17[%c3_70, %c0_71, %c0_72], %103 {strides = array<i32>} : memref<4x8x8xf32, #tpu.memory_space<vmem>>, vector<1x8x8xf32>,
    } else {
    }
    %3 = arith.index_cast %arg1 : i32 to index
    %c0 = arith.constant 0 : index
    %c0_1 = arith.constant 0 : index
    %4 = vector.load %arg15[%3, %c0, %c0_1] : memref<4x8x8xf32, #tpu.memory_space<vmem>>, vector<1x8x8xf32>
    %5 = vector.shape_cast %4 : vector<1x8x8xf32> to vector<8x8xf32>
    %6 = arith.index_cast %arg1 : i32 to index
    %c0_2 = arith.constant 0 : index
    %c0_3 = arith.constant 0 : index
    %7 = vector.load %arg16[%6, %c0_2, %c0_3] : memref<4x8x8xf32, #tpu.memory_space<vmem>>, vector<1x8x8xf32>
    %8 = vector.shape_cast %7 : vector<1x8x8xf32> to vector<8x8xf32>
    %9 = arith.index_cast %arg1 : i32 to index
    %c0_4 = arith.constant 0 : index
    %c0_5 = arith.constant 0 : index
    %10 = vector.load %arg17[%9, %c0_4, %c0_5] : memref<4x8x8xf32, #tpu.memory_space<vmem>>, vector<1x8x8xf32>
    %11 = vector.shape_cast %10 : vector<1x8x8xf32> to vector<8x8xf32>
    %12 = tpu.transpose %8, [1, 0] : vector<8x8xf32> -> vector<8x8xf32>
    %cst = arith.constant dense<0.000000e+00> : vector<8x8xf32>
    %13 = tpu.matmul %5, %12, %cst {dimension_numbers = #tpu.dot_dimension_numbers<[1], [0], [0], [1], [0, 0, 1, 1], [], []>} : vector<8x8xf32>, vector<8x8xf32>, vector<8x8xf32> -> vector<8x8xf32>
    %cst_6 = arith.constant dense<0xFF800000> : vector<8xf32>
    %14 = vector.multi_reduction <maximumf>, %13, %cst_6 [1] : vector<8x8xf32> to vector<8xf32>
    %15 = vector.shape_cast %14 : vector<8xf32> to vector<8x1xf32>
    %16 = vector.broadcast %15 : vector<8x1xf32> to vector<8x8xf32>
    %17 = arith.subf %13, %16 : vector<8x8xf32>
    %18 = math.exp %17 : vector<8x8xf32>
    %cst_7 = arith.constant dense<0.000000e+00> : vector<8xf32>
    %19 = vector.multi_reduction <add>, %18, %cst_7 [1] : vector<8x8xf32> to vector<8xf32>
    %20 = vector.shape_cast %19 : vector<8xf32> to vector<8x1xf32>
    %21 = tpu.reciprocal %20 : vector<8x1xf32> -> vector<8x1xf32>
    %22 = vector.broadcast %21 : vector<8x1xf32> to vector<8x8xf32>
    %23 = arith.mulf %18, %22 : vector<8x8xf32>
    %cst_8 = arith.constant dense<0.000000e+00> : vector<8x8xf32>
    %24 = tpu.matmul %23, %11, %cst_8 {dimension_numbers = #tpu.dot_dimension_numbers<[1], [0], [0], [1], [0, 0, 1, 1], [], []>} : vector<8x8xf32>, vector<8x8xf32>, vector<8x8xf32> -> vector<8x8xf32>
    %25 = arith.index_cast %arg1 : i32 to index
    %c0_9 = arith.constant 0 : index
    %c0_10 = arith.constant 0 : index
    %26 = vector.load %arg18[%25, %c0_9, %c0_10] : memref<4x8x8xf32, #tpu.memory_space<vmem>>, vector<1x8x8xf32>
    %27 = vector.shape_cast %26 : vector<1x8x8xf32> to vector<8x8xf32>
    %28 = vector.shape_cast %24 : vector<8x8xf32> to vector<1x8x8xf32>
    tpu.vector_store %arg18[%25, %c0_9, %c0_10], %28 {strides = array<i32>} : memref<4x8x8xf32, #tpu.memory_space<vmem>>, vector<1x8x8xf32>,
    %c0_11 = arith.constant 0 : index
    %c0_12 = arith.constant 0 : index
    %c0_13 = arith.constant 0 : index
    %c0_14 = arith.constant 0 : index
    %29 = vector.load %arg14[%c0_11, %c0_12, %c0_13, %c0_14] : memref<1x1x8x8xf32, #tpu.memory_space<vmem>>, vector<1x1x8x8xf32>
    %30 = vector.shape_cast %29 : vector<1x1x8x8xf32> to vector<8x8xf32>
    %31 = vector.shape_cast %23 : vector<8x8xf32> to vector<1x1x8x8xf32>
    tpu.vector_store %arg14[%c0_11, %c0_12, %c0_13, %c0_14], %31 {strides = array<i32>} : memref<1x1x8x8xf32, #tpu.memory_space<vmem>>, vector<1x1x8x8xf32>,
    %c3_i32 = arith.constant 3 : i32
    %32 = arith.cmpi eq, %arg1, %c3_i32 : i32
    %33 = arith.extui %32 : i1 to i32
    %c0_i32_15 = arith.constant 0 : i32
    %34 = arith.cmpi ne, %33, %c0_i32_15 : i32
    scf.if %34 {
      %c0_16 = arith.constant 0 : index
      %c0_17 = arith.constant 0 : index
      %c0_18 = arith.constant 0 : index
      %35 = vector.load %arg18[%c0_16, %c0_17, %c0_18] : memref<4x8x8xf32, #tpu.memory_space<vmem>>, vector<1x8x8xf32>
      %36 = vector.shape_cast %35 : vector<1x8x8xf32> to vector<8x8xf32>
      %c1 = arith.constant 1 : index
      %c0_19 = arith.constant 0 : index
      %c0_20 = arith.constant 0 : index
      %37 = vector.load %arg18[%c1, %c0_19, %c0_20] : memref<4x8x8xf32, #tpu.memory_space<vmem>>, vector<1x8x8xf32>
      %38 = vector.shape_cast %37 : vector<1x8x8xf32> to vector<8x8xf32>
      %c2 = arith.constant 2 : index
      %c0_21 = arith.constant 0 : index
      %c0_22 = arith.constant 0 : index
      %39 = vector.load %arg18[%c2, %c0_21, %c0_22] : memref<4x8x8xf32, #tpu.memory_space<vmem>>, vector<1x8x8xf32>
      %40 = vector.shape_cast %39 : vector<1x8x8xf32> to vector<8x8xf32>
      %c3 = arith.constant 3 : index
      %c0_23 = arith.constant 0 : index
      %c0_24 = arith.constant 0 : index
      %41 = vector.load %arg18[%c3, %c0_23, %c0_24] : memref<4x8x8xf32, #tpu.memory_space<vmem>>, vector<1x8x8xf32>
      %42 = vector.shape_cast %41 : vector<1x8x8xf32> to vector<8x8xf32>
      %43 = tpu.concatenate %36, %38, %40, %42 in 1 : vector<8x8xf32>, vector<8x8xf32>, vector<8x8xf32>, vector<8x8xf32> -> vector<8x32xf32>
      %c0_25 = arith.constant 0 : index
      %c0_26 = arith.constant 0 : index
      %44 = vector.load %arg11[%c0_25, %c0_26] : memref<32x32xf32, #tpu.memory_space<vmem>>, vector<32x32xf32>
      %cst_27 = arith.constant dense<0.000000e+00> : vector<8x32xf32>
      %45 = tpu.matmul %43, %44, %cst_27 {dimension_numbers = #tpu.dot_dimension_numbers<[1], [0], [0], [1], [0, 0, 1, 1], [], []>} : vector<8x32xf32>, vector<32x32xf32>, vector<8x32xf32> -> vector<8x32xf32>
      %c0_28 = arith.constant 0 : index
      %c0_29 = arith.constant 0 : index
      %46 = vector.load %arg12[%c0_28, %c0_29] : memref<1x32xf32, #tpu.memory_space<vmem>>, vector<1x32xf32>
      %47 = vector.broadcast %46 : vector<1x32xf32> to vector<8x32xf32>
      %48 = arith.addf %45, %47 : vector<8x32xf32>
      %c0_30 = arith.constant 0 : index
      %c0_31 = arith.constant 0 : index
      %c0_32 = arith.constant 0 : index
      %49 = vector.load %arg13[%c0_30, %c0_31, %c0_32] : memref<1x8x32xf32, #tpu.memory_space<vmem>>, vector<1x8x32xf32>
      %50 = vector.shape_cast %49 : vector<1x8x32xf32> to vector<8x32xf32>
      %51 = vector.shape_cast %48 : vector<8x32xf32> to vector<1x8x32xf32>
      tpu.vector_store %arg13[%c0_30, %c0_31, %c0_32], %51 {strides = array<i32>} : memref<1x8x32xf32, #tpu.memory_space<vmem>>, vector<1x8x32xf32>,
    } else {
    }
    return
  }
  func.func @transform_0(%arg0: i32, %arg1: i32) -> (i32, i32, i32) {
    %c0_i32 = arith.constant 0 : i32
    %c0_i32_0 = arith.constant 0 : i32
    %c0_i32_1 = arith.constant 0 : i32
    return %arg0, %c0_i32, %c0_i32_0 : i32, i32, i32
  }
  func.func @transform_1(%arg0: i32, %arg1: i32) -> (i32, i32, i32) {
    %c0_i32 = arith.constant 0 : i32
    %c0_i32_0 = arith.constant 0 : i32
    %c0_i32_1 = arith.constant 0 : i32
    return %arg0, %c0_i32, %c0_i32_0 : i32, i32, i32
  }
  func.func @transform_2(%arg0: i32, %arg1: i32) -> (i32, i32, i32) {
    %c0_i32 = arith.constant 0 : i32
    %c0_i32_0 = arith.constant 0 : i32
    %c0_i32_1 = arith.constant 0 : i32
    return %arg0, %c0_i32, %c0_i32_0 : i32, i32, i32
  }
  func.func @transform_3(%arg0: i32, %arg1: i32) -> (i32, i32) {
    %c0_i32 = arith.constant 0 : i32
    %c0_i32_0 = arith.constant 0 : i32
    %c0_i32_1 = arith.constant 0 : i32
    return %c0_i32, %c0_i32_0 : i32, i32
  }
  func.func @transform_4(%arg0: i32, %arg1: i32) -> (i32, i32) {
    %c0_i32 = arith.constant 0 : i32
    %c0_i32_0 = arith.constant 0 : i32
    %c0_i32_1 = arith.constant 0 : i32
    return %c0_i32, %c0_i32_0 : i32, i32
  }
  func.func @transform_5(%arg0: i32, %arg1: i32) -> (i32, i32) {
    %c0_i32 = arith.constant 0 : i32
    %c0_i32_0 = arith.constant 0 : i32
    %c0_i32_1 = arith.constant 0 : i32
    return %c0_i32, %c0_i32_0 : i32, i32
  }
  func.func @transform_6(%arg0: i32, %arg1: i32) -> (i32, i32) {
    %c0_i32 = arith.constant 0 : i32
    %c0_i32_0 = arith.constant 0 : i32
    %c0_i32_1 = arith.constant 0 : i32
    return %c0_i32, %c0_i32_0 : i32, i32
  }
  func.func @transform_7(%arg0: i32, %arg1: i32) -> (i32, i32) {
    %c0_i32 = arith.constant 0 : i32
    %c0_i32_0 = arith.constant 0 : i32
    %c0_i32_1 = arith.constant 0 : i32
    return %c0_i32, %c0_i32_0 : i32, i32
  }
  func.func @transform_8(%arg0: i32, %arg1: i32) -> (i32, i32) {
    %c0_i32 = arith.constant 0 : i32
    %c0_i32_0 = arith.constant 0 : i32
    %c0_i32_1 = arith.constant 0 : i32
    return %c0_i32, %c0_i32_0 : i32, i32
  }
  func.func @transform_9(%arg0: i32, %arg1: i32) -> (i32, i32) {
    %c0_i32 = arith.constant 0 : i32
    %c0_i32_0 = arith.constant 0 : i32
    %c0_i32_1 = arith.constant 0 : i32
    return %c0_i32, %c0_i32_0 : i32, i32
  }
  func.func @transform_10(%arg0: i32, %arg1: i32) -> (i32, i32) {
    %c0_i32 = arith.constant 0 : i32
    %c0_i32_0 = arith.constant 0 : i32
    %c0_i32_1 = arith.constant 0 : i32
    return %c0_i32, %c0_i32_0 : i32, i32
  }
  func.func @transform_11(%arg0: i32, %arg1: i32) -> (i32, i32, i32) {
    %c0_i32 = arith.constant 0 : i32
    %c0_i32_0 = arith.constant 0 : i32
    %c0_i32_1 = arith.constant 0 : i32
    return %arg0, %c0_i32, %c0_i32_0 : i32, i32, i32
  }
  func.func @transform_12(%arg0: i32, %arg1: i32) -> (i32, i32, i32, i32) {
    %c0_i32 = arith.constant 0 : i32
    %c0_i32_0 = arith.constant 0 : i32
    %c0_i32_1 = arith.constant 0 : i32
    return %arg0, %arg1, %c0_i32, %c0_i32_0 : i32, i32, i32, i32
  }
}

module attributes {stable_mosaic.version = 11 : i64} {
  func.func @_fused_attention_kernel(%arg0: i32, %arg1: i32, %arg2: memref<1x8x32xf32, #tpu.memory_space<vmem>>, %arg3: memref<1x8x32xf32, #tpu.memory_space<vmem>>, %arg4: memref<1x8x32xf32, #tpu.memory_space<vmem>>, %arg5: memref<32x32xf32, #tpu.memory_space<vmem>>, %arg6: memref<1x32xf32, #tpu.memory_space<vmem>>, %arg7: memref<32x32xf32, #tpu.memory_space<vmem>>, %arg8: memref<1x32xf32, #tpu.memory_space<vmem>>, %arg9: memref<32x32xf32, #tpu.memory_space<vmem>>, %arg10: memref<1x32xf32, #tpu.memory_space<vmem>>, %arg11: memref<32x32xf32, #tpu.memory_space<vmem>>, %arg12: memref<1x32xf32, #tpu.memory_space<vmem>>, %arg13: memref<1x8x32xf32, #tpu.memory_space<vmem>>, %arg14: memref<1x1x8x8xf32, #tpu.memory_space<vmem>>, %arg15: memref<4x8x8xf32, #tpu.memory_space<vmem>>, %arg16: memref<4x8x8xf32, #tpu.memory_space<vmem>>, %arg17: memref<4x8x8xf32, #tpu.memory_space<vmem>>, %arg18: memref<4x8x8xf32, #tpu.memory_space<vmem>>) attributes {dimension_semantics = [#tpu.dimension_semantics<parallel>, #tpu.dimension_semantics<arbitrary>], iteration_bounds = array<i64: 2, 4>, scalar_prefetch = 0 : i64, scratch_operands = 4 : i64, tpu.core_type = #tpu.core_type<tc>, window_params = [{transform_indices = @transform_0, window_bounds = array<i64: 1, 8, 32>}, {transform_indices = @transform_1, window_bounds = array<i64: 1, 8, 32>}, {transform_indices = @transform_2, window_bounds = array<i64: 1, 8, 32>}, {pipeline_mode = #tpu.pipeline_mode<synchronous>, transform_indices = @transform_3, window_bounds = array<i64: 32, 32>}, {pipeline_mode = #tpu.pipeline_mode<synchronous>, transform_indices = @transform_4, window_bounds = array<i64: 1, 32>}, {pipeline_mode = #tpu.pipeline_mode<synchronous>, transform_indices = @transform_5, window_bounds = array<i64: 32, 32>}, {pipeline_mode = #tpu.pipeline_mode<synchronous>, transform_indices = @transform_6, window_bounds = array<i64: 1, 32>}, {pipeline_mode = #tpu.pipeline_mode<synchronous>, transform_indices = @transform_7, window_bounds = array<i64: 32, 32>}, {pipeline_mode = #tpu.pipeline_mode<synchronous>, transform_indices = @transform_8, window_bounds = array<i64: 1, 32>}, {pipeline_mode = #tpu.pipeline_mode<synchronous>, transform_indices = @transform_9, window_bounds = array<i64: 32, 32>}, {pipeline_mode = #tpu.pipeline_mode<synchronous>, transform_indices = @transform_10, window_bounds = array<i64: 1, 32>}, {transform_indices = @transform_11, window_bounds = array<i64: 1, 8, 32>}, {transform_indices = @transform_12, window_bounds = array<i64: 1, 1, 8, 8>}]} {
    %c0_i32 = arith.constant 0 : i32
    %0 = arith.cmpi eq, %arg1, %c0_i32 : i32
    %1 = arith.extui %0 : i1 to i32
    %c0_i32_0 = arith.constant 0 : i32
    %2 = arith.cmpi ne, %1, %c0_i32_0 : i32
    scf.if %2 {
      %c0_16 = arith.constant 0 : index
      %c0_17 = arith.constant 0 : index
      %c0_18 = arith.constant 0 : index
      %35 = vector.load %arg2[%c0_16, %c0_17, %c0_18] : memref<1x8x32xf32, #tpu.memory_space<vmem>>, vector<1x8x32xf32>
      %36 = vector.shape_cast %35 : vector<1x8x32xf32> to vector<8x32xf32>
      %c0_19 = arith.constant 0 : index
      %c0_20 = arith.constant 0 : index
      %c0_21 = arith.constant 0 : index
      %37 = vector.load %arg3[%c0_19, %c0_20, %c0_21] : memref<1x8x32xf32, #tpu.memory_space<vmem>>, vector<1x8x32xf32>
      %38 = vector.shape_cast %37 : vector<1x8x32xf32> to vector<8x32xf32>
      %c0_22 = arith.constant 0 : index
      %c0_23 = arith.constant 0 : index
      %c0_24 = arith.constant 0 : index
      %39 = vector.load %arg4[%c0_22, %c0_23, %c0_24] : memref<1x8x32xf32, #tpu.memory_space<vmem>>, vector<1x8x32xf32>
      %40 = vector.shape_cast %39 : vector<1x8x32xf32> to vector<8x32xf32>
      %c0_25 = arith.constant 0 : index
      %c0_26 = arith.constant 0 : index
      %41 = vector.load %arg5[%c0_25, %c0_26] : memref<32x32xf32, #tpu.memory_space<vmem>>, vector<32x32xf32>
      %cst_27 = arith.constant dense<0.000000e+00> : vector<8x32xf32>
      %42 = tpu.matmul %36, %41, %cst_27 {dimension_numbers = #tpu.dot_dimension_numbers<[1], [0], [0], [1], [0, 0, 1, 1], [], []>} : vector<8x32xf32>, vector<32x32xf32>, vector<8x32xf32> -> vector<8x32xf32>
      %c0_28 = arith.constant 0 : index
      %c0_29 = arith.constant 0 : index
      %43 = vector.load %arg6[%c0_28, %c0_29] : memref<1x32xf32, #tpu.memory_space<vmem>>, vector<1x32xf32>
      %44 = vector.broadcast %43 : vector<1x32xf32> to vector<8x32xf32>
      %45 = arith.addf %42, %44 : vector<8x32xf32>
      %c0_30 = arith.constant 0 : index
      %c0_31 = arith.constant 0 : index
      %46 = vector.load %arg7[%c0_30, %c0_31] : memref<32x32xf32, #tpu.memory_space<vmem>>, vector<32x32xf32>
      %cst_32 = arith.constant dense<0.000000e+00> : vector<8x32xf32>
      %47 = tpu.matmul %38, %46, %cst_32 {dimension_numbers = #tpu.dot_dimension_numbers<[1], [0], [0], [1], [0, 0, 1, 1], [], []>} : vector<8x32xf32>, vector<32x32xf32>, vector<8x32xf32> -> vector<8x32xf32>
      %c0_33 = arith.constant 0 : index
      %c0_34 = arith.constant 0 : index
      %48 = vector.load %arg8[%c0_33, %c0_34] : memref<1x32xf32, #tpu.memory_space<vmem>>, vector<1x32xf32>
      %49 = vector.broadcast %48 : vector<1x32xf32> to vector<8x32xf32>
      %50 = arith.addf %47, %49 : vector<8x32xf32>
      %c0_35 = arith.constant 0 : index
      %c0_36 = arith.constant 0 : index
      %51 = vector.load %arg9[%c0_35, %c0_36] : memref<32x32xf32, #tpu.memory_space<vmem>>, vector<32x32xf32>
      %cst_37 = arith.constant dense<0.000000e+00> : vector<8x32xf32>
      %52 = tpu.matmul %40, %51, %cst_37 {dimension_numbers = #tpu.dot_dimension_numbers<[1], [0], [0], [1], [0, 0, 1, 1], [], []>} : vector<8x32xf32>, vector<32x32xf32>, vector<8x32xf32> -> vector<8x32xf32>
      %c0_38 = arith.constant 0 : index
      %c0_39 = arith.constant 0 : index
      %53 = vector.load %arg10[%c0_38, %c0_39] : memref<1x32xf32, #tpu.memory_space<vmem>>, vector<1x32xf32>
      %54 = vector.broadcast %53 : vector<1x32xf32> to vector<8x32xf32>
      %55 = arith.addf %52, %54 : vector<8x32xf32>
      %56 = vector.extract_strided_slice %45 {offsets = [0, 0], sizes = [8, 8], strides = [1, 1]} : vector<8x32xf32> to vector<8x8xf32>
      %c0_40 = arith.constant 0 : index
      %c0_41 = arith.constant 0 : index
      %c0_42 = arith.constant 0 : index
      %57 = vector.load %arg15[%c0_40, %c0_41, %c0_42] : memref<4x8x8xf32, #tpu.memory_space<vmem>>, vector<1x8x8xf32>
      %58 = vector.shape_cast %57 : vector<1x8x8xf32> to vector<8x8xf32>
      %59 = vector.shape_cast %56 : vector<8x8xf32> to vector<1x8x8xf32>
      tpu.vector_store %arg15[%c0_40, %c0_41, %c0_42], %59 {strides = array<i32>} : memref<4x8x8xf32, #tpu.memory_space<vmem>>, vector<1x8x8xf32>,
      %60 = vector.extract_strided_slice %50 {offsets = [0, 0], sizes = [8, 8], strides = [1, 1]} : vector<8x32xf32> to vector<8x8xf32>
      %c0_43 = arith.constant 0 : index
      %c0_44 = arith.constant 0 : index
      %c0_45 = arith.constant 0 : index
      %61 = vector.load %arg16[%c0_43, %c0_44, %c0_45] : memref<4x8x8xf32, #tpu.memory_space<vmem>>, vector<1x8x8xf32>
      %62 = vector.shape_cast %61 : vector<1x8x8xf32> to vector<8x8xf32>
      %63 = vector.shape_cast %60 : vector<8x8xf32> to vector<1x8x8xf32>
      tpu.vector_store %arg16[%c0_43, %c0_44, %c0_45], %63 {strides = array<i32>} : memref<4x8x8xf32, #tpu.memory_space<vmem>>, vector<1x8x8xf32>,
      %64 = vector.extract_strided_slice %55 {offsets = [0, 0], sizes = [8, 8], strides = [1, 1]} : vector<8x32xf32> to vector<8x8xf32>
      %c0_46 = arith.constant 0 : index
      %c0_47 = arith.constant 0 : index
      %c0_48 = arith.constant 0 : index
      %65 = vector.load %arg17[%c0_46, %c0_47, %c0_48] : memref<4x8x8xf32, #tpu.memory_space<vmem>>, vector<1x8x8xf32>
      %66 = vector.shape_cast %65 : vector<1x8x8xf32> to vector<8x8xf32>
      %67 = vector.shape_cast %64 : vector<8x8xf32> to vector<1x8x8xf32>
      tpu.vector_store %arg17[%c0_46, %c0_47, %c0_48], %67 {strides = array<i32>} : memref<4x8x8xf32, #tpu.memory_space<vmem>>, vector<1x8x8xf32>,
      %68 = vector.extract_strided_slice %45 {offsets = [0, 8], sizes = [8, 8], strides = [1, 1]} : vector<8x32xf32> to vector<8x8xf32>
      %c1 = arith.constant 1 : index
      %c0_49 = arith.constant 0 : index
      %c0_50 = arith.constant 0 : index
      %69 = vector.load %arg15[%c1, %c0_49, %c0_50] : memref<4x8x8xf32, #tpu.memory_space<vmem>>, vector<1x8x8xf32>
      %70 = vector.shape_cast %69 : vector<1x8x8xf32> to vector<8x8xf32>
      %71 = vector.shape_cast %68 : vector<8x8xf32> to vector<1x8x8xf32>
      tpu.vector_store %arg15[%c1, %c0_49, %c0_50], %71 {strides = array<i32>} : memref<4x8x8xf32, #tpu.memory_space<vmem>>, vector<1x8x8xf32>,
      %72 = vector.extract_strided_slice %50 {offsets = [0, 8], sizes = [8, 8], strides = [1, 1]} : vector<8x32xf32> to vector<8x8xf32>
      %c1_51 = arith.constant 1 : index
      %c0_52 = arith.constant 0 : index
      %c0_53 = arith.constant 0 : index
      %73 = vector.load %arg16[%c1_51, %c0_52, %c0_53] : memref<4x8x8xf32, #tpu.memory_space<vmem>>, vector<1x8x8xf32>
      %74 = vector.shape_cast %73 : vector<1x8x8xf32> to vector<8x8xf32>
      %75 = vector.shape_cast %72 : vector<8x8xf32> to vector<1x8x8xf32>
      tpu.vector_store %arg16[%c1_51, %c0_52, %c0_53], %75 {strides = array<i32>} : memref<4x8x8xf32, #tpu.memory_space<vmem>>, vector<1x8x8xf32>,
      %76 = vector.extract_strided_slice %55 {offsets = [0, 8], sizes = [8, 8], strides = [1, 1]} : vector<8x32xf32> to vector<8x8xf32>
      %c1_54 = arith.constant 1 : index
      %c0_55 = arith.constant 0 : index
      %c0_56 = arith.constant 0 : index
      %77 = vector.load %arg17[%c1_54, %c0_55, %c0_56] : memref<4x8x8xf32, #tpu.memory_space<vmem>>, vector<1x8x8xf32>
      %78 = vector.shape_cast %77 : vector<1x8x8xf32> to vector<8x8xf32>
      %79 = vector.shape_cast %76 : vector<8x8xf32> to vector<1x8x8xf32>
      tpu.vector_store %arg17[%c1_54, %c0_55, %c0_56], %79 {strides = array<i32>} : memref<4x8x8xf32, #tpu.memory_space<vmem>>, vector<1x8x8xf32>,
      %80 = vector.extract_strided_slice %45 {offsets = [0, 16], sizes = [8, 8], strides = [1, 1]} : vector<8x32xf32> to vector<8x8xf32>
      %c2 = arith.constant 2 : index
      %c0_57 = arith.constant 0 : index
      %c0_58 = arith.constant 0 : index
      %81 = vector.load %arg15[%c2, %c0_57, %c0_58] : memref<4x8x8xf32, #tpu.memory_space<vmem>>, vector<1x8x8xf32>
      %82 = vector.shape_cast %81 : vector<1x8x8xf32> to vector<8x8xf32>
      %83 = vector.shape_cast %80 : vector<8x8xf32> to vector<1x8x8xf32>
      tpu.vector_store %arg15[%c2, %c0_57, %c0_58], %83 {strides = array<i32>} : memref<4x8x8xf32, #tpu.memory_space<vmem>>, vector<1x8x8xf32>,
      %84 = vector.extract_strided_slice %50 {offsets = [0, 16], sizes = [8, 8], strides = [1, 1]} : vector<8x32xf32> to vector<8x8xf32>
      %c2_59 = arith.constant 2 : index
      %c0_60 = arith.constant 0 : index
      %c0_61 = arith.constant 0 : index
      %85 = vector.load %arg16[%c2_59, %c0_60, %c0_61] : memref<4x8x8xf32, #tpu.memory_space<vmem>>, vector<1x8x8xf32>
      %86 = vector.shape_cast %85 : vector<1x8x8xf32> to vector<8x8xf32>
      %87 = vector.shape_cast %84 : vector<8x8xf32> to vector<1x8x8xf32>
      tpu.vector_store %arg16[%c2_59, %c0_60, %c0_61], %87 {strides = array<i32>} : memref<4x8x8xf32, #tpu.memory_space<vmem>>, vector<1x8x8xf32>,
      %88 = vector.extract_strided_slice %55 {offsets = [0, 16], sizes = [8, 8], strides = [1, 1]} : vector<8x32xf32> to vector<8x8xf32>
      %c2_62 = arith.constant 2 : index
      %c0_63 = arith.constant 0 : index
      %c0_64 = arith.constant 0 : index
      %89 = vector.load %arg17[%c2_62, %c0_63, %c0_64] : memref<4x8x8xf32, #tpu.memory_space<vmem>>, vector<1x8x8xf32>
      %90 = vector.shape_cast %89 : vector<1x8x8xf32> to vector<8x8xf32>
      %91 = vector.shape_cast %88 : vector<8x8xf32> to vector<1x8x8xf32>
      tpu.vector_store %arg17[%c2_62, %c0_63, %c0_64], %91 {strides = array<i32>} : memref<4x8x8xf32, #tpu.memory_space<vmem>>, vector<1x8x8xf32>,
      %92 = vector.extract_strided_slice %45 {offsets = [0, 24], sizes = [8, 8], strides = [1, 1]} : vector<8x32xf32> to vector<8x8xf32>
      %c3 = arith.constant 3 : index
      %c0_65 = arith.constant 0 : index
      %c0_66 = arith.constant 0 : index
      %93 = vector.load %arg15[%c3, %c0_65, %c0_66] : memref<4x8x8xf32, #tpu.memory_space<vmem>>, vector<1x8x8xf32>
      %94 = vector.shape_cast %93 : vector<1x8x8xf32> to vector<8x8xf32>
      %95 = vector.shape_cast %92 : vector<8x8xf32> to vector<1x8x8xf32>
      tpu.vector_store %arg15[%c3, %c0_65, %c0_66], %95 {strides = array<i32>} : memref<4x8x8xf32, #tpu.memory_space<vmem>>, vector<1x8x8xf32>,
      %96 = vector.extract_strided_slice %50 {offsets = [0, 24], sizes = [8, 8], strides = [1, 1]} : vector<8x32xf32> to vector<8x8xf32>
      %c3_67 = arith.constant 3 : index
      %c0_68 = arith.constant 0 : index
      %c0_69 = arith.constant 0 : index
      %97 = vector.load %arg16[%c3_67, %c0_68, %c0_69] : memref<4x8x8xf32, #tpu.memory_space<vmem>>, vector<1x8x8xf32>
      %98 = vector.shape_cast %97 : vector<1x8x8xf32> to vector<8x8xf32>
      %99 = vector.shape_cast %96 : vector<8x8xf32> to vector<1x8x8xf32>
      tpu.vector_store %arg16[%c3_67, %c0_68, %c0_69], %99 {strides = array<i32>} : memref<4x8x8xf32, #tpu.memory_space<vmem>>, vector<1x8x8xf32>,
      %100 = vector.extract_strided_slice %55 {offsets = [0, 24], sizes = [8, 8], strides = [1, 1]} : vector<8x32xf32> to vector<8x8xf32>
      %c3_70 = arith.constant 3 : index
      %c0_71 = arith.constant 0 : index
      %c0_72 = arith.constant 0 : index
      %101 = vector.load %arg17[%c3_70, %c0_71, %c0_72] : memref<4x8x8xf32, #tpu.memory_space<vmem>>, vector<1x8x8xf32>
      %102 = vector.shape_cast %101 : vector<1x8x8xf32> to vector<8x8xf32>
      %103 = vector.shape_cast %100 : vector<8x8xf32> to vector<1x8x8xf32>
      tpu.vector_store %arg17[%c3_70, %c0_71, %c0_72], %103 {strides = array<i32>} : memref<4x8x8xf32, #tpu.memory_space<vmem>>, vector<1x8x8xf32>,
    } else {
    }
    %3 = arith.index_cast %arg1 : i32 to index
    %c0 = arith.constant 0 : index
    %c0_1 = arith.constant 0 : index
    %4 = vector.load %arg15[%3, %c0, %c0_1] : memref<4x8x8xf32, #tpu.memory_space<vmem>>, vector<1x8x8xf32>
    %5 = vector.shape_cast %4 : vector<1x8x8xf32> to vector<8x8xf32>
    %6 = arith.index_cast %arg1 : i32 to index
    %c0_2 = arith.constant 0 : index
    %c0_3 = arith.constant 0 : index
    %7 = vector.load %arg16[%6, %c0_2, %c0_3] : memref<4x8x8xf32, #tpu.memory_space<vmem>>, vector<1x8x8xf32>
    %8 = vector.shape_cast %7 : vector<1x8x8xf32> to vector<8x8xf32>
    %9 = arith.index_cast %arg1 : i32 to index
    %c0_4 = arith.constant 0 : index
    %c0_5 = arith.constant 0 : index
    %10 = vector.load %arg17[%9, %c0_4, %c0_5] : memref<4x8x8xf32, #tpu.memory_space<vmem>>, vector<1x8x8xf32>
    %11 = vector.shape_cast %10 : vector<1x8x8xf32> to vector<8x8xf32>
    %12 = tpu.transpose %8, [1, 0] : vector<8x8xf32> -> vector<8x8xf32>
    %cst = arith.constant dense<0.000000e+00> : vector<8x8xf32>
    %13 = tpu.matmul %5, %12, %cst {dimension_numbers = #tpu.dot_dimension_numbers<[1], [0], [0], [1], [0, 0, 1, 1], [], []>} : vector<8x8xf32>, vector<8x8xf32>, vector<8x8xf32> -> vector<8x8xf32>
    %cst_6 = arith.constant dense<0xFF800000> : vector<8xf32>
    %14 = vector.multi_reduction <maximumf>, %13, %cst_6 [1] : vector<8x8xf32> to vector<8xf32>
    %15 = vector.shape_cast %14 : vector<8xf32> to vector<8x1xf32>
    %16 = vector.broadcast %15 : vector<8x1xf32> to vector<8x8xf32>
    %17 = arith.subf %13, %16 : vector<8x8xf32>
    %18 = math.exp %17 : vector<8x8xf32>
    %cst_7 = arith.constant dense<0.000000e+00> : vector<8xf32>
    %19 = vector.multi_reduction <add>, %18, %cst_7 [1] : vector<8x8xf32> to vector<8xf32>
    %20 = vector.shape_cast %19 : vector<8xf32> to vector<8x1xf32>
    %21 = tpu.reciprocal %20 : vector<8x1xf32> -> vector<8x1xf32>
    %22 = vector.broadcast %21 : vector<8x1xf32> to vector<8x8xf32>
    %23 = arith.mulf %18, %22 : vector<8x8xf32>
    %cst_8 = arith.constant dense<0.000000e+00> : vector<8x8xf32>
    %24 = tpu.matmul %23, %11, %cst_8 {dimension_numbers = #tpu.dot_dimension_numbers<[1], [0], [0], [1], [0, 0, 1, 1], [], []>} : vector<8x8xf32>, vector<8x8xf32>, vector<8x8xf32> -> vector<8x8xf32>
    %25 = arith.index_cast %arg1 : i32 to index
    %c0_9 = arith.constant 0 : index
    %c0_10 = arith.constant 0 : index
    %26 = vector.load %arg18[%25, %c0_9, %c0_10] : memref<4x8x8xf32, #tpu.memory_space<vmem>>, vector<1x8x8xf32>
    %27 = vector.shape_cast %26 : vector<1x8x8xf32> to vector<8x8xf32>
    %28 = vector.shape_cast %24 : vector<8x8xf32> to vector<1x8x8xf32>
    tpu.vector_store %arg18[%25, %c0_9, %c0_10], %28 {strides = array<i32>} : memref<4x8x8xf32, #tpu.memory_space<vmem>>, vector<1x8x8xf32>,
    %c0_11 = arith.constant 0 : index
    %c0_12 = arith.constant 0 : index
    %c0_13 = arith.constant 0 : index
    %c0_14 = arith.constant 0 : index
    %29 = vector.load %arg14[%c0_11, %c0_12, %c0_13, %c0_14] : memref<1x1x8x8xf32, #tpu.memory_space<vmem>>, vector<1x1x8x8xf32>
    %30 = vector.shape_cast %29 : vector<1x1x8x8xf32> to vector<8x8xf32>
    %31 = vector.shape_cast %23 : vector<8x8xf32> to vector<1x1x8x8xf32>
    tpu.vector_store %arg14[%c0_11, %c0_12, %c0_13, %c0_14], %31 {strides = array<i32>} : memref<1x1x8x8xf32, #tpu.memory_space<vmem>>, vector<1x1x8x8xf32>,
    %c3_i32 = arith.constant 3 : i32
    %32 = arith.cmpi eq, %arg1, %c3_i32 : i32
    %33 = arith.extui %32 : i1 to i32
    %c0_i32_15 = arith.constant 0 : i32
    %34 = arith.cmpi ne, %33, %c0_i32_15 : i32
    scf.if %34 {
      %c0_16 = arith.constant 0 : index
      %c0_17 = arith.constant 0 : index
      %c0_18 = arith.constant 0 : index
      %35 = vector.load %arg18[%c0_16, %c0_17, %c0_18] : memref<4x8x8xf32, #tpu.memory_space<vmem>>, vector<1x8x8xf32>
      %36 = vector.shape_cast %35 : vector<1x8x8xf32> to vector<8x8xf32>
      %c1 = arith.constant 1 : index
      %c0_19 = arith.constant 0 : index
      %c0_20 = arith.constant 0 : index
      %37 = vector.load %arg18[%c1, %c0_19, %c0_20] : memref<4x8x8xf32, #tpu.memory_space<vmem>>, vector<1x8x8xf32>
      %38 = vector.shape_cast %37 : vector<1x8x8xf32> to vector<8x8xf32>
      %c2 = arith.constant 2 : index
      %c0_21 = arith.constant 0 : index
      %c0_22 = arith.constant 0 : index
      %39 = vector.load %arg18[%c2, %c0_21, %c0_22] : memref<4x8x8xf32, #tpu.memory_space<vmem>>, vector<1x8x8xf32>
      %40 = vector.shape_cast %39 : vector<1x8x8xf32> to vector<8x8xf32>
      %c3 = arith.constant 3 : index
      %c0_23 = arith.constant 0 : index
      %c0_24 = arith.constant 0 : index
      %41 = vector.load %arg18[%c3, %c0_23, %c0_24] : memref<4x8x8xf32, #tpu.memory_space<vmem>>, vector<1x8x8xf32>
      %42 = vector.shape_cast %41 : vector<1x8x8xf32> to vector<8x8xf32>
      %43 = tpu.concatenate %36, %38, %40, %42 in 1 : vector<8x8xf32>, vector<8x8xf32>, vector<8x8xf32>, vector<8x8xf32> -> vector<8x32xf32>
      %c0_25 = arith.constant 0 : index
      %c0_26 = arith.constant 0 : index
      %44 = vector.load %arg11[%c0_25, %c0_26] : memref<32x32xf32, #tpu.memory_space<vmem>>, vector<32x32xf32>
      %cst_27 = arith.constant dense<0.000000e+00> : vector<8x32xf32>
      %45 = tpu.matmul %43, %44, %cst_27 {dimension_numbers = #tpu.dot_dimension_numbers<[1], [0], [0], [1], [0, 0, 1, 1], [], []>} : vector<8x32xf32>, vector<32x32xf32>, vector<8x32xf32> -> vector<8x32xf32>
      %c0_28 = arith.constant 0 : index
      %c0_29 = arith.constant 0 : index
      %46 = vector.load %arg12[%c0_28, %c0_29] : memref<1x32xf32, #tpu.memory_space<vmem>>, vector<1x32xf32>
      %47 = vector.broadcast %46 : vector<1x32xf32> to vector<8x32xf32>
      %48 = arith.addf %45, %47 : vector<8x32xf32>
      %c0_30 = arith.constant 0 : index
      %c0_31 = arith.constant 0 : index
      %c0_32 = arith.constant 0 : index
      %49 = vector.load %arg13[%c0_30, %c0_31, %c0_32] : memref<1x8x32xf32, #tpu.memory_space<vmem>>, vector<1x8x32xf32>
      %50 = vector.shape_cast %49 : vector<1x8x32xf32> to vector<8x32xf32>
      %51 = vector.shape_cast %48 : vector<8x32xf32> to vector<1x8x32xf32>
      tpu.vector_store %arg13[%c0_30, %c0_31, %c0_32], %51 {strides = array<i32>} : memref<1x8x32xf32, #tpu.memory_space<vmem>>, vector<1x8x32xf32>,
    } else {
    }
    return
  }
  func.func @transform_0(%arg0: i32, %arg1: i32) -> (i32, i32, i32) {
    %c0_i32 = arith.constant 0 : i32
    %c0_i32_0 = arith.constant 0 : i32
    %c0_i32_1 = arith.constant 0 : i32
    return %arg0, %c0_i32, %c0_i32_0 : i32, i32, i32
  }
  func.func @transform_1(%arg0: i32, %arg1: i32) -> (i32, i32, i32) {
    %c0_i32 = arith.constant 0 : i32
    %c0_i32_0 = arith.constant 0 : i32
    %c0_i32_1 = arith.constant 0 : i32
    return %arg0, %c0_i32, %c0_i32_0 : i32, i32, i32
  }
  func.func @transform_2(%arg0: i32, %arg1: i32) -> (i32, i32, i32) {
    %c0_i32 = arith.constant 0 : i32
    %c0_i32_0 = arith.constant 0 : i32
    %c0_i32_1 = arith.constant 0 : i32
    return %arg0, %c0_i32, %c0_i32_0 : i32, i32, i32
  }
  func.func @transform_3(%arg0: i32, %arg1: i32) -> (i32, i32) {
    %c0_i32 = arith.constant 0 : i32
    %c0_i32_0 = arith.constant 0 : i32
    %c0_i32_1 = arith.constant 0 : i32
    return %c0_i32, %c0_i32_0 : i32, i32
  }
  func.func @transform_4(%arg0: i32, %arg1: i32) -> (i32, i32) {
    %c0_i32 = arith.constant 0 : i32
    %c0_i32_0 = arith.constant 0 : i32
    %c0_i32_1 = arith.constant 0 : i32
    return %c0_i32, %c0_i32_0 : i32, i32
  }
  func.func @transform_5(%arg0: i32, %arg1: i32) -> (i32, i32) {
    %c0_i32 = arith.constant 0 : i32
    %c0_i32_0 = arith.constant 0 : i32
    %c0_i32_1 = arith.constant 0 : i32
    return %c0_i32, %c0_i32_0 : i32, i32
  }
  func.func @transform_6(%arg0: i32, %arg1: i32) -> (i32, i32) {
    %c0_i32 = arith.constant 0 : i32
    %c0_i32_0 = arith.constant 0 : i32
    %c0_i32_1 = arith.constant 0 : i32
    return %c0_i32, %c0_i32_0 : i32, i32
  }
  func.func @transform_7(%arg0: i32, %arg1: i32) -> (i32, i32) {
    %c0_i32 = arith.constant 0 : i32
    %c0_i32_0 = arith.constant 0 : i32
    %c0_i32_1 = arith.constant 0 : i32
    return %c0_i32, %c0_i32_0 : i32, i32
  }
  func.func @transform_8(%arg0: i32, %arg1: i32) -> (i32, i32) {
    %c0_i32 = arith.constant 0 : i32
    %c0_i32_0 = arith.constant 0 : i32
    %c0_i32_1 = arith.constant 0 : i32
    return %c0_i32, %c0_i32_0 : i32, i32
  }
  func.func @transform_9(%arg0: i32, %arg1: i32) -> (i32, i32) {
    %c0_i32 = arith.constant 0 : i32
    %c0_i32_0 = arith.constant 0 : i32
    %c0_i32_1 = arith.constant 0 : i32
    return %c0_i32, %c0_i32_0 : i32, i32
  }
  func.func @transform_10(%arg0: i32, %arg1: i32) -> (i32, i32) {
    %c0_i32 = arith.constant 0 : i32
    %c0_i32_0 = arith.constant 0 : i32
    %c0_i32_1 = arith.constant 0 : i32
    return %c0_i32, %c0_i32_0 : i32, i32
  }
  func.func @transform_11(%arg0: i32, %arg1: i32) -> (i32, i32, i32) {
    %c0_i32 = arith.constant 0 : i32
    %c0_i32_0 = arith.constant 0 : i32
    %c0_i32_1 = arith.constant 0 : i32
    return %arg0, %c0_i32, %c0_i32_0 : i32, i32, i32
  }
  func.func @transform_12(%arg0: i32, %arg1: i32) -> (i32, i32, i32, i32) {
    %c0_i32 = arith.constant 0 : i32
    %c0_i32_0 = arith.constant 0 : i32
    %c0_i32_1 = arith.constant 0 : i32
    return %arg0, %arg1, %c0_i32, %c0_i32_0 : i32, i32, i32, i32
  }
}

</mosaic_0001>

<bundles_post_ra>
// kernel: tpu_custom_call.1
= control target key start
LH: loop header
LB: loop body
LE: loop exit
PB: predicated region body
PF: predicated region fallthrough
CT: control target
= control target key end

     0   :  { %s2740_s0 = inlined_call_operand.hbm [shape: f32[2,8,32], index: 0, kind: input, shape index: {}]   ;;  %s2741_s1 = inlined_call_operand.hbm [shape: f32[2,8,32], index: 1, kind: input, shape index: {}]   ;;  %s2742_s2 = inlined_call_operand.hbm [shape: f32[2,8,32], index: 2, kind: input, shape index: {}]   ;;  %s2743_s3 = inlined_call_operand.hbm [shape: f32[32,32], index: 3, kind: input, shape index: {}]   ;;  %s2744_s4 = inlined_call_operand.vmem [shape: f32[1,32], index: 4, kind: input, shape index: {}]   ;;  %s2745_s5 = inlined_call_operand.hbm [shape: f32[32,32], index: 5, kind: input, shape index: {}]   ;;  %s2746_s6 = inlined_call_operand.vmem [shape: f32[1,32], index: 6, kind: input, shape index: {}]   ;;  %s2747_s7 = inlined_call_operand.hbm [shape: f32[32,32], index: 7, kind: input, shape index: {}]   ;;  %s2748_s8 = inlined_call_operand.hbm [shape: f32[1,32], index: 8, kind: input, shape index: {}]   ;;  %s2749_s9 = inlined_call_operand.vmem [shape: f32[32,32], index: 9, kind: input, shape index: {}]   ;;  %s2750_s10 = inlined_call_operand.vmem [shape: f32[1,32], index: 10, kind: input, shape index: {}]   ;;  %s2751_s11 = inlined_call_operand.hbm [shape: f32[2,8,32], index: 11, kind: output, shape index: {0}]   ;;  %s2752_s12 = inlined_call_operand.hbm [shape: f32[2,4,8,8], index: 12, kind: output, shape index: {1}]  }
   0x1   :  { %2785 = sst [smem:[#allocation41_spill]] %s2741_s1 }
   0x2   :  { %2786 = sst [smem:[#allocation42_spill]] %s2742_s2 }
   0x3   :  { %2787 = sst [smem:[#allocation43_spill]] %s2743_s3 }
   0x4   :  { %2788 = sst [smem:[#allocation44_spill]] %s2744_s4 }
   0x5   :  { %2789 = sst [smem:[#allocation45_spill]] %s2746_s6 }
   0x6   :  { %2790 = sst [smem:[#allocation46_spill]] %s2747_s7 }
   0x7   :  { %2791 = sst [smem:[#allocation47_spill]] %s2749_s9 }
   0x8   :  { %2792 = sst [smem:[#allocation48_spill]] %s2750_s10 }
   0x9   :  { %2793 = sst [smem:[#allocation49_spill]] %s2751_s11 }
   0xa   :  { %2794 = sst [smem:[#allocation50_spill]] %s2752_s12 }
   0xb   :  { %18 = vsyncpa [#allocation7], 0 }
   0xc   :  { %20 = vsyncpa [#allocation7 + $0x1], 0 }
   0xd   :  { %21 = vsyncpa [#allocation10], 0 }
   0xe   :  { %23 = vsyncpa [#allocation10 + $0x1], 0 }
   0xf   :  { %24 = vsyncpa [#allocation13], 0 }
  0x10   :  { %25 = vsyncpa [#allocation16], 0 }
  0x11   :  { %26 = vsyncpa [#allocation8], 0 }
  0x12   :  { %28 = vsyncpa [#allocation8 + $0x1], 0 }
  0x13   :  { %29 = vsyncpa [#allocation20], 0 }
  0x14   :  { %31 = vsyncpa [#allocation20 + $0x1], 0  ;;  %s2201_s21 = smov 0   ;;  %s2203_s22 = smov 0  }
  0x15   :  { %s2205_s23 = smov 0   ;;  %s2207_s24 = smov 0  }
  0x16   :  { %s2209_s25 = smov 0   ;;  %s2211_s26 = smov 0  }
  0x17   :  { %s2213_s27 = smov 0   ;;  %s2215_s28 = smov 0  }
  0x18   :  { %s2217_s29 = smov 0   ;;  %s2219_s30 = smov 0  }
  0x19   :  { %s2221_s13 = smov 0  }
  0x1a LB: > { %2795 = sst [smem:[#allocation27_spill]] %s2069_s21  ;;  %s2257_s14 = sadd.s32 4294967295, %s2109_s13   ;;  %s2109_s13 = sphi %s2221_s13, %s37_s13   ;;  %s2105_s30 = sphi %s2219_s30, %s2865_s30   ;;  %s2101_s29 = sphi %s2217_s29, %s2871_s29   ;;  %s2097_s28 = sphi %s2215_s28, %s2863_s28   ;;  %s2093_s27 = sphi %s2213_s27, %s2862_s27   ;;  %s2089_s26 = sphi %s2211_s26, %s2870_s26   ;;  %s2085_s25 = sphi %s2209_s25, %s2869_s25   ;;  %s2081_s24 = sphi %s2207_s24, %s2868_s24   ;;  %s2077_s23 = sphi %s2205_s23, %s2860_s23   ;;  %s2073_s22 = sphi %s2203_s22, %s2867_s22   ;;  %s2069_s21 = sphi %s2201_s21, %s2866_s21  }
  0x1b   : > { %2796 = sst [smem:[#allocation28_spill]] %s2077_s23  ;;  %p1418_p0 = scmp.ge.s32.totalorder %s2109_s13, 1 }
  0x1c   : > { %2797 = sst [smem:[#allocation29_spill]] %s2081_s24  ;;  %p2757_p1 = scmp.eq.s32.totalorder %s2257_s14, 0 }
  0x1d   : > { %2798 = sst [smem:[#allocation30_spill]] %s2093_s27  ;;  %p354_p2 = scmp.lt.s32.totalorder %s2109_s13, 9 }
  0x1e   : > { %2799 = sst [smem:[#allocation31_spill]] %s2097_s28  ;;  %s2111_s16 = smov [#allocation12]  }
  0x1f   : > { %2800 = sst [smem:[#allocation32_spill]] %s2101_s29  ;;  %p2262_p3 = pnand %p1418_p0, %p354_p2 }
  0x20   : > { %2801 = sst [smem:[#allocation33_spill]] %s2105_s30  ;;  %s366_s17 = sshll.u32 %s2111_s16, 4  ;;  %s367_s17 = int_to_ptr.vmem [resolvable:$true] %s366_s17 }
  0x21   : > { %s2802_s15 = scalar_select %p2262_p3, 1, 0 }
  0x22   : > { %p1589_p4 = pneg %p2262_p3  ;;  %s2112_s19 = smov [#allocation15]  }
  0x23   : > { %2803 = sst [smem:[#allocation34_spill]] %s2802_s15  ;;  %s398_s20 = sshll.u32 %s2112_s19, 4  ;;  %s2274_s20 = int_to_ptr.vmem [resolvable:$true] %s398_s20 }
  0x24   : > { %p2270_p5 = pnand %p1589_p4, %p2757_p1  ;;  %s2805_s3 = sld [smem:[#allocation43_spill]] }
  0x26   : > { %s2804_s18 = scalar_select %p2270_p5, 1, 0 }
  0x27   : > { %p2284_p7 = pneg %p2270_p5 }
  0x29   : > { %s2806_s16 = scalar_select %p2284_p7, 1, 0 }
  0x2a   : > { %s1741_s28 = scalar_lea.hbm %s2805_s3, 512 }
  0x2b   : > { %p1742_p6 = scmp.ne.s32.totalorder %s2805_s3, %s1741_s28  ;;  %p1748_p10 = scmp.lt.u32.totalorder %s1741_s28, %s2805_s3 }
  0x2d   : > { %p1744_p8 = pnand %p2284_p7, %p1742_p6 }
  0x2f   : > { %p1745_p9 = pneg %p1744_p8 }
  0x31   : > { %p1750_p11 = pnand %p1748_p10, %p1745_p9 }
  0x33   : > { %1753 = shalt.err (!%p1750_p11)
}
  0x34   : > { %s1754_s11 = scalar_lea.vmem %s367_s17, 512  ;;  %p1762_p2 = scmp.lt.s32.totalorder %s367_s17, %s367_s17 }
  0x35   : > { %p1755_p12 = scmp.ne.s32.totalorder %s367_s17, %s1754_s11  ;;  %p1763_p4 = scmp.lt.s32.totalorder %s1754_s11, %s1754_s11 }
  0x37   : > { %p1757_p13 = pnand %p1755_p12, %p2284_p7  ;;  %p1764_p1 = por %p1763_p4, %p1762_p2 }
  0x39   : > { %p1758_p0 = pneg %p1757_p13 }
  0x3b   : > { %p1765_p3 = pnand %p1764_p1, %p1758_p0 }
  0x3d   : > { %1768 = shalt.err (!%p1765_p3)
}
  0x3e   : > { %s2762_s9 = smov 128   ;;  %s2763_s10 = smov 8  }
  0x3f   : > { %1592 = dma.hbm_to_vmem [thread:$0]  (!%p2270_p5), %s2805_s3, 512, %s367_s17, [#allocation13], %s2762_s9, %s2762_s9, %s2763_s10  }
  0x40   : > { %s2807_s7 = sld [smem:[#allocation46_spill]] }
  0x46   : > { %s1769_s4 = scalar_lea.hbm %s2807_s7, 512 }
  0x47   : > { %p1770_p1 = scmp.ne.s32.totalorder %s2807_s7, %s1769_s4  ;;  %p1776_p8 = scmp.lt.u32.totalorder %s1769_s4, %s2807_s7 }
  0x49   : > { %p1772_p3 = pnand %p1770_p1, %p2284_p7 }
  0x4b   : > { %p1773_p6 = pneg %p1772_p3 }
  0x4d   : > { %p1778_p9 = pnand %p1776_p8, %p1773_p6 }
  0x4f   : > { %1781 = shalt.err (!%p1778_p9)
}
  0x50   : > { %s1782_s17 = scalar_lea.vmem %s2274_s20, 512  ;;  %p1790_p13 = scmp.lt.s32.totalorder %s2274_s20, %s2274_s20 }
  0x51   : > { %p1783_p10 = scmp.ne.s32.totalorder %s2274_s20, %s1782_s17  ;;  %p1791_p0 = scmp.lt.s32.totalorder %s1782_s17, %s1782_s17 }
  0x53   : > { %p1785_p11 = pnand %p1783_p10, %p2284_p7  ;;  %p1792_p2 = por %p1791_p0, %p1790_p13 }
  0x55   : > { %p1786_p12 = pneg %p1785_p11 }
  0x57   : > { %p1793_p4 = pnand %p1792_p2, %p1786_p12 }
  0x59   : > { %1796 = shalt.err (!%p1793_p4)
}
  0x5a   : > { %1598 = dma.hbm_to_vmem [thread:$0]  (!%p2270_p5), %s2807_s7, 512, %s2274_s20, [#allocation16], %s2762_s9, %s2762_s9, %s2763_s10  }
  0x5b   : > { %s1417_s27 = sadd.s32 4294967294, %s2109_s13   ;;  %s46_s15 = sadd.s32 1, %s2101_s29 }
  0x5c   : > { %p47_p1 = scmp.ge.s32.totalorder %s46_s15, 4  ;;  %s49_s6 = sadd.s32 1, %s2105_s30 }
  0x5d   : > { %s56_s12 = sadd.s32 1, %s2089_s26  ;;  %p63_p3 = scmp.ne.s32.totalorder %s2089_s26, %s2085_s25 }
  0x5e   : > { %s2873_s15 = smov (%p47_p1, %s46_s15), 0  ;;  %s2875_s6 = smov (!%p47_p1, %s49_s6), %s2105_s30 }
  0x5f   : > { %2808 = sst [smem:[#allocation35_spill]] %s2873_s15  ;;  %p64_p6 = scmp.eq.s32.totalorder %s2109_s13, 0 }
  0x60   : > { %p69_p8 = scmp.ne.s32.totalorder %s2085_s25, %s2081_s24  ;;  %p51_p9 = scmp.ge.s32.totalorder %s2875_s6, 2 }
  0x61   : > { %p313_p10 = scmp.eq.s32.totalorder %s2257_s14, 7  ;;  %p2342_p11 = por %p64_p6, %p63_p3 }
  0x62   : > { %p2810_p12 = scmp.eq.s32.totalorder %s2257_s14, 0  ;;  %s2877_s6 = smov (%p51_p9, %s2875_s6), 0 }
  0x63   : > { %2812 = sst [smem:[#allocation36_spill]] %s2877_s6  ;;  %p2356_p0 = por %p313_p10, %p63_p3 }
  0x64   : > { %p2348_p13 = por %p2810_p12, %p69_p8  ;;  %p2360_p2 = scmp.eq.s32.totalorder %s1417_s27, 7 }
  0x65   : > { %s2813_s19 = scalar_select %p2356_p0, 1, 0 }
  0x66   : > { %s2811_s28 = scalar_select %p2348_p13, 1, 0 }
  0x67   : > { %s53_s17 = ssub.s32 %s2105_s30, %s2877_s6  ;;  %s326_s2 = ssub.s32 %s2101_s29, %s2873_s15 }
  0x68   : > { %p54_p4 = scmp.eq.s32.totalorder %s53_s17, 0  ;;  %p2370_p1 = por %p2360_p2, %p69_p8 }
  0x69   : > { %s327_s9 = sor.u32 %s326_s2, %s53_s17  ;;  %s330_s10 = sadd.s32 1, %s2077_s23 }
  0x6a   : > { %s2815_s4 = scalar_select %p2370_p1, 1, 0 }
  0x6b   : > { %s2376_s27 = scalar_select %p54_p4, %s2089_s26, %s56_s12  }
  0x6c   : > { %2816 = sst [smem:[#allocation37_spill]] %s2815_s4  ;;  %p328_p3 = scmp.eq.s32.totalorder %s327_s9, 0 }
  0x6d   : > { %2817 = sst [smem:[#allocation38_spill]] %s2376_s27  ;;  %p340_p6 = scmp.ne.s32.totalorder %s2077_s23, %s2073_s22 }
  0x6e   : > { %p346_p9 = scmp.ne.s32.totalorder %s2073_s22, %s2069_s21  ;;  %p1623_p12 = scmp.lt.s32.totalorder %s2109_s13, 8 }
  0x6f   : > { %s2384_s3 = scalar_select %p328_p3, %s2077_s23, %s330_s10  }
  0x70   : > { %p2388_p0 = por %p340_p6, %p313_p10  ;;  %p2394_p8 = por %p346_p9, %p2360_p2 }
  0x71   : > { %2818 = sst [smem:[#allocation39_spill]] %s2384_s3  ;;  %s2769_s17 = sand.u32 1, %s2089_s26  }
  0x72   : > { %s2819_s7 = scalar_select %p2388_p0, 1, 0 }
  0x73   : > { %s2820_s6 = scalar_select %p2394_p8, 1, 0 }
  0x74   : > { %s2400_s2 = sshll.u32 %s2105_s30, 7  ;;  %s2404_s9 = sshll.u32 %s2769_s17, 3 }
  0x75   : > { %2821 = sst [smem:[#allocation40_spill]] %s2820_s6  ;;  %p2408_p4 = pnand %p1623_p12, %p2342_p11 }
  0x76   : > { %s447_s12 = sand.u32 1, %s2109_s13   ;;  %s2823_s1 = sld [smem:[#allocation41_spill]] }
  0x77   : > { %s2822_s10 = scalar_select %p2408_p4, 1, 0 }
  0x78   : > { %s451_s30 = scalar_lea.vmem [#allocation9], %s2404_s9  ;;  %s2422_s20 = scalar_lea.sflag [#allocation10], %s447_s12 }
  0x79   : > { %s458_s17 = sshll.u32 %s451_s30, 4  ;;  %p2428_p11 = pneg %p2408_p4  ;;  %s2420_s17 = int_to_ptr.vmem [resolvable:$true] %s458_s17 }
  0x7b   : > { %s2824_s3 = scalar_select %p2428_p11, 1, 0 }
  0x7c   : > { %s2417_s29 = scalar_lea.hbm %s2823_s1, %s2400_s2  ;;  %s1802_s23 = scalar_lea.hbm %s2823_s1, 256 }
  0x7d   : > { %s1797_s27 = scalar_lea.hbm %s2417_s29, 128  ;;  %p1803_p6 = scmp.lt.u32.totalorder %s2417_s29, %s2823_s1 }
  0x7e   : > { %p1798_p10 = scmp.ne.s32.totalorder %s2417_s29, %s1797_s27  ;;  %p1804_p9 = scmp.lt.u32.totalorder %s1802_s23, %s1797_s27 }
  0x7f   : > { %p1806_p8 = scmp.lt.u32.totalorder %s1797_s27, %s2417_s29 }
  0x80   : > { %p1800_p2 = pnand %p2428_p11, %p1798_p10  ;;  %p1805_p12 = por %p1804_p9, %p1803_p6 }
  0x82   : > { %p1801_p3 = pneg %p1800_p2  ;;  %p1807_p1 = por %p1806_p8, %p1805_p12 }
  0x84   : > { %p1808_p0 = pnand %p1807_p1, %p1801_p3 }
  0x86   : > { %1811 = shalt.err (!%p1808_p0)
}
  0x87   : > { %s1812_s12 = scalar_lea.vmem %s2420_s17, 128  ;;  %s2115_s15 = smov [#allocation9]  }
  0x88   : > { %p1813_p10 = scmp.ne.s32.totalorder %s2420_s17, %s1812_s12  ;;  %s1817_s11 = sshll.u32 %s2115_s15, 4  ;;  %s1818_s11 = int_to_ptr.vmem [resolvable:$false] %s1817_s11 }
  0x89   : > { %s1819_s6 = scalar_lea.vmem %s1818_s11, 256  ;;  %p1820_p5 = scmp.lt.s32.totalorder %s2420_s17, %s1818_s11 }
  0x8a   : > { %p1815_p2 = pnand %p1813_p10, %p2428_p11  ;;  %p1821_p7 = scmp.lt.s32.totalorder %s1819_s6, %s1812_s12 }
  0x8c   : > { %p1816_p13 = pneg %p1815_p2  ;;  %p1822_p6 = por %p1821_p7, %p1820_p5 }
  0x8e   : > { %p1823_p9 = pnand %p1822_p6, %p1816_p13 }
  0x90   : > { %1826 = shalt.err (!%p1823_p9)
}
  0x91   : > { %1608 = dma.hbm_to_vmem [thread:$0]  (!%p2408_p4), %s2417_s29, 128, %s2420_s17, %s2422_s20  }
  0x92   : > { %s2116_s23 = smov [#allocation14]   ;;  %s2117_s30 = smov [#allocation17]  }
  0x93   : > { %s382_s27 = sshll.u32 %s2116_s23, 4  ;;  %s412_s1 = sshll.u32 %s2117_s30, 4  ;;  %s383_s27 = int_to_ptr.vmem [resolvable:$true] %s382_s27  ;;  %s413_s1 = int_to_ptr.vmem [resolvable:$true] %s412_s1 }
  0x94   : > { %s1827_s11 = scalar_lea.hbm %s2745_s5, 512  ;;  %p2825_p7 = scmp.ne.s32.totalorder %s2806_s16, 0 }
  0x95   : > { %p1828_p5 = scmp.ne.s32.totalorder %s2745_s5, %s1827_s11  ;;  %p1834_p1 = scmp.lt.u32.totalorder %s1827_s11, %s2745_s5 }
  0x97   : > { %p1830_p13 = pnand %p1828_p5, %p2825_p7 }
  0x99   : > { %p1831_p0 = pneg %p1830_p13 }
  0x9b   : > { %p1836_p8 = pnand %p1834_p1, %p1831_p0 }
  0x9d   : > { %1839 = shalt.err (!%p1836_p8)
}
  0x9e   : > { %s1840_s29 = scalar_lea.vmem %s383_s27, 512  ;;  %p1848_p2 = scmp.lt.s32.totalorder %s383_s27, %s383_s27 }
  0x9f   : > { %p1841_p3 = scmp.ne.s32.totalorder %s383_s27, %s1840_s29  ;;  %p1849_p6 = scmp.lt.s32.totalorder %s1840_s29, %s1840_s29 }
  0xa1   : > { %p1843_p12 = pnand %p1841_p3, %p2825_p7  ;;  %p1850_p9 = por %p1849_p6, %p1848_p2 }
  0xa3   : > { %p1844_p10 = pneg %p1843_p12 }
  0xa5   : > { %p1851_p4 = pnand %p1850_p9, %p1844_p10 }
  0xa7   : > { %1854 = shalt.err (!%p1851_p4)
}
  0xa8   : > { %p2826_p5 = scmp.ne.s32.totalorder %s2804_s18, 0  ;;  %s2827_s21 = smov 8  }
  0xa9   : > { %s2828_s17 = smov 128   ;;  %s1855_s15 = scalar_lea.hbm %s2748_s8, 16 }
  0xaa   : > { %1595 = dma.hbm_to_vmem [thread:$0]  (!%p2826_p5), %s2745_s5, 512, %s383_s27, [#allocation13], %s2828_s17, %s2828_s17, %s2827_s21  }
  0xab   : > { %p1856_p13 = scmp.ne.s32.totalorder %s2748_s8, %s1855_s15  ;;  %p1862_p1 = scmp.lt.u32.totalorder %s1855_s15, %s2748_s8 }
  0xad   : > { %p1858_p4 = pnand %p1856_p13, %p2825_p7 }
  0xaf   : > { %p1859_p0 = pneg %p1858_p4 }
  0xb1   : > { %p1864_p8 = pnand %p1862_p1, %p1859_p0 }
  0xb3   : > { %1867 = shalt.err (!%p1864_p8)
}
  0xb4   : > { %s1868_s24 = scalar_lea.vmem %s413_s1, 16  ;;  %s1875_s27 = scalar_lea.vmem %s413_s1, 32 }
  0xb5   : > { %p1869_p3 = scmp.ne.s32.totalorder %s413_s1, %s1868_s24  ;;  %p1876_p2 = scmp.lt.s32.totalorder %s413_s1, %s413_s1 }
  0xb6   : > { %p1877_p6 = scmp.lt.s32.totalorder %s1875_s27, %s1868_s24 }
  0xb7   : > { %p1871_p12 = pnand %p1869_p3, %p2825_p7 }
  0xb8   : > { %p1878_p9 = por %p1877_p6, %p1876_p2 }
  0xb9   : > { %p1872_p10 = pneg %p1871_p12 }
  0xbb   : > { %p1879_p11 = pnand %p1878_p9, %p1872_p10 }
  0xbd   : > { %1882 = shalt.err (!%p1879_p11)
}
  0xbe   : > { %1601 = dma.hbm_to_vmem [thread:$0]  (!%p2826_p5), %s2748_s8, 16, %s413_s1, [#allocation16]  }
  0xbf   : > { %s2495_s23 = scalar_lea.hbm %s2740_s0, %s2400_s2  ;;  %s433_s30 = scalar_lea.vmem [#allocation6], %s2404_s9 }
  0xc0   : > { %s440_s18 = sshll.u32 %s433_s30, 4  ;;  %s2829_s12 = sld [smem:[#allocation42_spill]]  ;;  %s2498_s18 = int_to_ptr.vmem [resolvable:$true] %s440_s18 }
  0xc1   : > { %s2830_s29 = sand.u32 1, %s2089_s26   ;;  %s1883_s24 = scalar_lea.hbm %s2495_s23, 128 }
  0xc2   : > { %s430_s1 = scalar_lea.sflag [#allocation7], %s2830_s29  ;;  %p1884_p11 = scmp.ne.s32.totalorder %s2495_s23, %s1883_s24 }
  0xc3   : > { %p2831_p7 = scmp.ne.s32.totalorder %s2824_s3, 0  ;;  %s1888_s17 = scalar_lea.hbm %s2740_s0, 256 }
  0xc4   : > { %p1889_p4 = scmp.lt.u32.totalorder %s2495_s23, %s2740_s0  ;;  %p1890_p0 = scmp.lt.u32.totalorder %s1888_s17, %s1883_s24 }
  0xc5   : > { %p1886_p5 = pnand %p1884_p11, %p2831_p7  ;;  %p1892_p8 = scmp.lt.u32.totalorder %s1883_s24, %s2495_s23 }
  0xc6   : > { %s2504_s6 = scalar_lea.hbm %s2829_s12, %s2400_s2  ;;  %p1891_p1 = por %p1890_p0, %p1889_p4 }
  0xc7   : > { %p1887_p13 = pneg %p1886_p5 }
  0xc8   : > { %p1893_p3 = por %p1892_p8, %p1891_p1 }
  0xca   : > { %p1894_p12 = pnand %p1893_p3, %p1887_p13 }
  0xcc   : > { %1897 = shalt.err (!%p1894_p12)
}
  0xcd   : > { %s1898_s2 = scalar_lea.vmem %s2498_s18, 128  ;;  %s2118_s30 = smov [#allocation6]  }
  0xce   : > { %p1899_p10 = scmp.ne.s32.totalorder %s2498_s18, %s1898_s2  ;;  %s1903_s15 = sshll.u32 %s2118_s30, 4  ;;  %s1904_s15 = int_to_ptr.vmem [resolvable:$false] %s1903_s15 }
  0xcf   : > { %s1905_s11 = scalar_lea.vmem %s1904_s15, 256  ;;  %p1906_p9 = scmp.lt.s32.totalorder %s2498_s18, %s1904_s15 }
  0xd0   : > { %p1901_p2 = pnand %p1899_p10, %p2831_p7  ;;  %p1907_p11 = scmp.lt.s32.totalorder %s1905_s11, %s1898_s2 }
  0xd2   : > { %p1902_p6 = pneg %p1901_p2  ;;  %p1908_p5 = por %p1907_p11, %p1906_p9 }
  0xd4   : > { %p1909_p4 = pnand %p1908_p5, %p1902_p6 }
  0xd6   : > { %1912 = shalt.err (!%p1909_p4)
}
  0xd7   : > { %p2832_p13 = scmp.ne.s32.totalorder %s2822_s10, 0  ;;  %s469_s29 = scalar_lea.vmem [#allocation11], %s2404_s9 }
  0xd8   : > { %s476_s24 = sshll.u32 %s469_s29, 4  ;;  %s1913_s27 = scalar_lea.hbm %s2504_s6, 128  ;;  %s477_s24 = int_to_ptr.vmem [resolvable:$true] %s476_s24 }
  0xd9   : > { %1605 = dma.hbm_to_vmem [thread:$0]  (!%p2832_p13), %s2495_s23, 128, %s2498_s18, %s430_s1  }
  0xda   : > { %p1914_p0 = scmp.ne.s32.totalorder %s2504_s6, %s1913_s27  ;;  %s1918_s16 = scalar_lea.hbm %s2829_s12, 256 }
  0xdb   : > { %p1919_p3 = scmp.lt.u32.totalorder %s2504_s6, %s2829_s12  ;;  %p1920_p12 = scmp.lt.u32.totalorder %s1918_s16, %s1913_s27 }
  0xdc   : > { %p1916_p1 = pnand %p1914_p0, %p2831_p7  ;;  %p1922_p2 = scmp.lt.u32.totalorder %s1913_s27, %s2504_s6 }
  0xdd   : > { %p1921_p10 = por %p1920_p12, %p1919_p3 }
  0xde   : > { %p1917_p8 = pneg %p1916_p1 }
  0xdf   : > { %p1923_p6 = por %p1922_p2, %p1921_p10 }
  0xe1   : > { %p1924_p9 = pnand %p1923_p6, %p1917_p8 }
  0xe3   : > { %1927 = shalt.err (!%p1924_p9)
}
  0xe4   : > { %s1928_s9 = scalar_lea.vmem %s477_s24, 128  ;;  %s2119_s23 = smov [#allocation11]  }
  0xe5   : > { %p1929_p11 = scmp.ne.s32.totalorder %s477_s24, %s1928_s9  ;;  %s1933_s18 = sshll.u32 %s2119_s23, 4  ;;  %s1934_s18 = int_to_ptr.vmem [resolvable:$false] %s1933_s18 }
  0xe6   : > { %s1935_s1 = scalar_lea.vmem %s1934_s18, 256  ;;  %p1936_p0 = scmp.lt.s32.totalorder %s477_s24, %s1934_s18 }
  0xe7   : > { %p1931_p5 = pnand %p1929_p11, %p2831_p7  ;;  %p1937_p1 = scmp.lt.s32.totalorder %s1935_s1, %s1928_s9 }
  0xe9   : > { %p1932_p4 = pneg %p1931_p5  ;;  %p1938_p13 = por %p1937_p1, %p1936_p0 }
  0xeb   : > { %p1939_p3 = pnand %p1938_p13, %p1932_p4 }
  0xed   : > { %1942 = shalt.err (!%p1939_p3)
}
  0xee   : > { %p2833_p12 = scmp.ne.s32.totalorder %s2822_s10, 0  ;;  %s2834_s30 = sld [smem:[#allocation34_spill]] }
  0xf0   : > { %1611 = dma.hbm_to_vmem [thread:$0]  (!%p2833_p12), %s2504_s6, 128, %s477_s24, %s2422_s20  }
  0xf4   : > { %p2835_p8 = scmp.ne.s32.totalorder %s2834_s30, 0 }
  0xf5   : > { %s2551_s3 = sand.u32 (!%p2835_p8), 1, %s2085_s25   ;;  %p2836_p7 = scmp.ne.s32.totalorder (!%p2835_p8), %s2811_s28, 0 }
  0xf6   : > { %485 = sbr.rel (%p2835_p8) target bundleno = 1777 (0x6f1), region = 64  ;;  %s2554_s15 = sshll.u32 (!%p2835_p8), %s2551_s3, 3 }
  0xf7   : > { %s488_s11 = scalar_lea.sflag (!%p2835_p8), [#allocation7], %s2551_s3  ;;  %s491_s29 = scalar_lea.vmem (!%p2835_p8), [#allocation6], %s2554_s15 }
  0xfd   : > { %2044 = dma.done.wait (%p2836_p7), %s488_s11, 128  }
  0xfe   : > { %2046 = vsyncadd (%p2836_p7), %s488_s11, 4294967168  ;;  %s496_s10 = sand.u32 1, %s2257_s14   ;;  %s500_s6 = scalar_lea.vmem [#allocation9], %s2554_s15 }
  0xff   : > { %s497_s20 = scalar_lea.sflag [#allocation10], %s496_s10 }
 0x100   : > { %2048 = dma.done.wait (%p2836_p7), %s497_s20, 256  }
 0x101   : > { %2050 = vsyncadd (%p2836_p7), %s497_s20, 4294967040  ;;  %s509_s24 = scalar_lea.vmem [#allocation11], %s2554_s15  ;;  %p2837_p13 = scmp.eq.s32.totalorder %s2257_s14, 0 }
 0x103   : > { %2052 = dma.done.wait (%p2837_p13), [#allocation13], 1024   ;;  %p2838_p10 = pmov %p2837_p13 }
 0x105   : > { %2054 = vsyncadd (%p2838_p10), [#allocation13], 4294966272  ;;  %p2839_p2 = pmov %p2838_p10 }
 0x107   : > { %2056 = dma.done.wait (%p2839_p2), [#allocation16], 528   ;;  %p2840_p6 = pmov %p2839_p2 }
 0x108   : > { %s578_s27 = sand.u32 1, %s2073_s22   ;;  %s573_s21 = scalar_lea.vmem [#allocation18], %s2554_s15 }
 0x109   : > { %2058 = vsyncadd (%p2840_p6), [#allocation16], 4294966768  ;;  %s2580_s28 = sshll.u32 %s578_s27, 3  ;;  %s2841_s16 = sld [smem:[#allocation30_spill]] }
 0x10a   : > { %s580_s17 = scalar_lea.vmem [#allocation19], %s2580_s28 }
 0x10f   : > { %p1440_p9 = scmp.ne.s32.totalorder %s2841_s16, 0 }
 0x110   : > { %v588_v0 = vld [vmem:[#allocation12] sm:$0xff] (!%p1440_p9)  ;;  %v589_v1 = vld [vmem:[#allocation12 + $0x8] sm:$0xff] (!%p1440_p9)  ;;  %v2120_v3 = vmov (!%p1440_p9), 0.0|0.0   ;;  %v590_v6 = vld [vmem:[#allocation12 + $0x10] sm:$0xff] (!%p1440_p9)  ;;  %vm2121_vm0 = vmmov (!%p1440_p9), 0   ;;  %v2122_v9 = vmov (!%p1440_p9), 0.0  }
 0x111   : > { %584 = sbr.rel (%p1440_p9) target bundleno = 628 (0x274), region = 96  ;;  %v673_v2 = vld [vmem:[#allocation14] sm:$0xff] (!%p1440_p9)  ;;  %1539 = vmatprep.subr.bf16.mxu0 (!%p1440_p9), %v2120_v3  ;;  %v1540_v4 = vpack.c.bf16 (!%p1440_p9), %v589_v1, %v588_v0  ;;  %1545 = vmatprep.subr.bf16.mxu1 (!%p1440_p9), %v2120_v3  ;;  %v674_v5 = vld [vmem:[#allocation14 + $0x8] sm:$0xff] (!%p1440_p9)  ;;  %v591_v7 = vld [vmem:[#allocation12 + $0x18] sm:$0xff] (!%p1440_p9)  ;;  %vm599_vm1 = vcmask (!%p1440_p9), 261120   ;;  %s2842_s2 = sld [smem:[#allocation44_spill]] (!%p1440_p9) }
 0x112   : > { %v1546_v8 = vpack.c.bf16 (!%p1440_p9), %v674_v5, %v673_v2  ;;  %1493 = vmatprep.mubr.msk.f32.mxu0 (!%p1440_p9), %vm2121_vm0, %v2122_v9  ;;  %v675_v10 = vld [vmem:[#allocation14 + $0x10] sm:$0xff] (!%p1440_p9)  ;;  %v676_v11 = vld [vmem:[#allocation14 + $0x18] sm:$0xff] (!%p1440_p9)  ;;  %1504 = vmatprep.mubr.msk.f32.mxu1 (!%p1440_p9), %vm2121_vm0, %v2122_v9  ;;  %v1543_v12 = vpack.c.bf16 (!%p1440_p9), %v591_v7, %v590_v6  ;;  %v757_v14 = vld [vmem:[#allocation15] sm:$0xff] (!%p1440_p9)  ;;  %s2843_s18 = sld [smem:[#allocation45_spill]] (!%p1440_p9)  ;;  %vm841_vm2 = vcmask (!%p1440_p9), 64512   ;;  %s2123_s1 = smov (!%p1440_p9), 112  }
 0x113   : > { %1541 = vmatpush3.bf16.msra.mxu0 (!%p1440_p9), %v1540_v4  ;;  %v1549_v13 = vpack.c.bf16 (!%p1440_p9), %v676_v11, %v675_v10  ;;  %v758_v15 = vld [vmem:[#allocation15 + $0x8] sm:$0xff] (!%p1440_p9)  ;;  %v585_v16 = vld [vmem:[%s491_s29] sm:$0xff] (!%p1440_p9)  ;;  %s2124_s30 = smov (!%p1440_p9), 120   ;;  %v1445_v31 = vld [vmem:[#allocation17] ss:$0 sm:$0xff] (!%p1440_p9)  ;;  %s2125_s11 = smov (!%p1440_p9), 104  }
 0x114   : > { %1542 = vmatprep.subr.bf16.mxu0 (!%p1440_p9), %v2120_v3  ;;  %1547 = vmatpush3.bf16.msra.mxu1 (!%p1440_p9), %v1546_v8  ;;  %v1552_v17 = vpack.c.bf16 (!%p1440_p9), %v758_v15, %v757_v14  ;;  %v586_v18 = vld [vmem:[%s500_s6] sm:$0xff] (!%p1440_p9)  ;;  %v759_v19 = vld [vmem:[#allocation15 + $0x10] sm:$0xff] (!%p1440_p9)  ;;  %v760_v20 = vld [vmem:[#allocation15 + $0x18] sm:$0xff] (!%p1440_p9) }
 0x115   : > { %1548 = vmatprep.subr.bf16.mxu1 (!%p1440_p9), %v2120_v3  ;;  %v1555_v21 = vpack.c.bf16 (!%p1440_p9), %v760_v20, %v759_v19  ;;  %v587_v22 = vld [vmem:[%s509_s24] sm:$0xff] (!%p1440_p9) }
 0x117   : > { %1544 = vmatpush3.bf16.msra.mxu0 (!%p1440_p9), %v1543_v12  ;;  %v1441_v23 = vld [vmem:[%s2842_s2] ss:$0 sm:$0xff] (!%p1440_p9) }
 0x118   : > { %1550 = vmatpush3.bf16.msra.mxu1 %v1549_v13  ;;  %1551 = vmatprep.subr.bf16.mxu0 %v2120_v3  ;;  %v1443_v24 = vld [vmem:[%s2843_s18] ss:$0 sm:$0xff] }
 0x11a   : > { %1494 = vmatmul.mubr.msk.f32.vlgmr.msra.gmra.mrb[0].mxu0 %vm599_vm1, %v585_v16 }
 0x11b   : > { %1553 = vmatpush3.bf16.msra.mxu0 %v1552_v17  ;;  %1505 = vmatmul.mubr.msk.f32.vlgmr.msra.gmra.mrb[0].mxu1 %vm599_vm1, %v586_v18 }
 0x11c   : > { %1554 = vmatprep.subr.bf16.mxu0 %v2120_v3  ;;  %1515 = vmatprep.mubr.msk.f32.mxu0 %vm2121_vm0, %v2122_v9 }
 0x11f   : > { %1556 = vmatpush3.bf16.msra.mxu0 %v1555_v21 }
 0x122   : > { %1516 = vmatmul.mubr.msk.f32.vlgmr.msra.gmra.mrb[2].mxu0 %vm599_vm1, %v587_v22 }
 0x1ed   : > { %v669_v25 = vpop.f32.mrb[0].mxu0 }
 0x1ee   : > { %v670_v26 = vadd.f32 %v1441_v23, %v669_v25  ;;  %v1495_v27 = vpop.f32.mrb[1].mxu0  ;;  %v753_v28 = vpop.f32.mrb[0].mxu1 }
 0x1ef   : > { %v754_v29 = vadd.f32 %v1443_v24, %v753_v28  ;;  %v1506_v30 = vpop.f32.mrb[1].mxu1 }
 0x1f0   : > { %842 = vst.msk [vmem:[#allocation2] sm:$0xff] %vm841_vm2, %v670_v26  ;;  %863 = vrot.lane.b32.xlu1 %v670_v26, %s2123_s1  ;;  %846 = vrot.lane.b32.xlu0 %v670_v26, %s2124_s30 }
 0x1f1   : > { %843 = vst.msk [vmem:[#allocation3] sm:$0xff] %vm841_vm2, %v754_v29 }
 0x1f4   : > { %852 = vrot.lane.b32.xlu0 %v754_v29, %s2124_s30 }
 0x1f5   : > { %v837_v32 = vpop.f32.mrb[2].mxu0 }
 0x1f6   : > { %v838_v33 = vadd.f32 %v1445_v31, %v837_v32  ;;  %v1517_v34 = vpop.f32.mrb[3].mxu0 }
 0x1f8   : > { %844 = vst.msk [vmem:[#allocation4] sm:$0xff] %vm841_vm2, %v838_v33  ;;  %868 = vrot.lane.b32.xlu0 %v754_v29, %s2123_s1  ;;  %858 = vrot.lane.b32.xlu1 %v838_v33, %s2124_s30 }
 0x1fc   : > { %878 = vrot.lane.b32.xlu0 %v670_v26, %s2125_s11  ;;  %873 = vrot.lane.b32.xlu1 %v838_v33, %s2123_s1 }
 0x200   : > { %888 = vrot.lane.b32.xlu0 %v838_v33, %s2125_s11  ;;  %883 = vrot.lane.b32.xlu1 %v754_v29, %s2125_s11 }
 0x262   : > { %v864_v35 = vpop.permute.xlu1 %863  ;;  %v847_v36 = vpop.permute.xlu0 %846 }
 0x263   : > { %867 = vst.msk [vmem:[#allocation2 + $0x10] sm:$0xff] %vm841_vm2, %v864_v35  ;;  %850 = vst.msk [vmem:[#allocation2 + $0x8] sm:$0xff] %vm841_vm2, %v847_v36 }
 0x266   : > { %v853_v37 = vpop.permute.xlu0 %852 }
 0x267   : > { %856 = vst.msk [vmem:[#allocation3 + $0x8] sm:$0xff] %vm841_vm2, %v853_v37 }
 0x26a   : > { %v869_v38 = vpop.permute.xlu0 %868  ;;  %v859_v39 = vpop.permute.xlu1 %858 }
 0x26b   : > { %872 = vst.msk [vmem:[#allocation3 + $0x10] sm:$0xff] %vm841_vm2, %v869_v38  ;;  %862 = vst.msk [vmem:[#allocation4 + $0x8] sm:$0xff] %vm841_vm2, %v859_v39 }
 0x26e   : > { %v879_v40 = vpop.permute.xlu0 %878  ;;  %v874_v41 = vpop.permute.xlu1 %873 }
 0x26f   : > { %882 = vst.msk [vmem:[#allocation2 + $0x18] sm:$0xff] %vm841_vm2, %v879_v40  ;;  %877 = vst.msk [vmem:[#allocation4 + $0x10] sm:$0xff] %vm841_vm2, %v874_v41 }
 0x272   : > { %v889_v42 = vpop.permute.xlu0 %888  ;;  %v884_v43 = vpop.permute.xlu1 %883 }
 0x273   : > { %892 = vst.msk [vmem:[#allocation4 + $0x18] sm:$0xff] %vm841_vm2, %v889_v42  ;;  %887 = vst.msk [vmem:[#allocation3 + $0x18] sm:$0xff] %vm841_vm2, %v884_v43 }
 0x274 PF: > { %s2844_s29 = sld [smem:[#allocation30_spill]]  ;;  %vm900_vm3 = vcmask 64512   ;;  %v2126_v44 = vmov 0.0   ;;  %vm2127_vm4 = vmmov 0  }
 0x275   : > { %1518 = vmatprep.subr.mxu0 %v2126_v44  ;;  %1520 = vmatprep.mubr.msk.f32.mxu0 %vm2127_vm4, %v2126_v44 }
 0x276   : > { %1523 = vmatprep.subr.mxu1 %v2126_v44  ;;  %1525 = vmatprep.mubr.msk.f32.mxu1 %vm2127_vm4, %v2126_v44 }
 0x27a   : > { %s2613_s10 = sshll.u32 %s2844_s29, 3  ;;  %p1451_p11 = scmp.ne.s32.totalorder %s2844_s29, 3 }
 0x27b   : > { %s896_s20 = scalar_lea.vmem [#allocation3], %s2613_s10  ;;  %s894_s6 = scalar_lea.vmem [#allocation2], %s2613_s10  ;;  %v2129_v63 = vmov (!%p1451_p11), 0.0|0.0   ;;  %vm2131_vm5 = vmmov (!%p1451_p11), 0   ;;  %v2132_v6 = vmov (!%p1451_p11), 0.0   ;;  %vm1088_vm6 = vcmask (!%p1451_p11), 130048  }
 0x27c   : > { %v897_v45 = vld [vmem:[%s896_s20] sm:$0xff]  ;;  %s898_s24 = scalar_lea.vmem [#allocation4], %s2613_s10  ;;  %s1061_s16 = scalar_lea.vmem [#allocation5], %s2613_s10  ;;  %vm1090_vm7 = vcmask (!%p1451_p11), 195584   ;;  %vm1103_vm8 = vcmask (!%p1451_p11), 261120  }
 0x27d   : > { %1519 = vmatpush3.xpose.msk.msra.mxu0 %vm900_vm3, %v897_v45  ;;  %v895_v46 = vld [vmem:[%s894_s6] sm:$0xff]  ;;  %s2128_s14 = smov (!%p1451_p11), 8   ;;  %s2845_s9 = sld [smem:[#allocation47_spill]] (!%p1451_p11) }
 0x27e   : > { %v899_v55 = vld [vmem:[%s898_s24] sm:$0xff]  ;;  %1557 = vmatprep.subr.bf16.mxu0 (!%p1451_p11), %v2129_v63  ;;  %s2130_s1 = smov (!%p1451_p11), 24   ;;  %s2133_s20 = smov (!%p1451_p11), 16  }
 0x27f   : > { %1524 = vmatpush3.msra.mxu1 %v899_v55 }
 0x280   : > { %1521 = vmatmul.mubr.msk.f32.vlgmr.msra.gmra.mrb[0].mxu0 %vm900_vm3, %v895_v46 }
 0x281   : > { %1536 = vmatprep.mubr.msk.f32.mxu0 (!%p1451_p11), %vm2131_vm5, %v2132_v6 }
 0x283   : > { %v1092_v0 = vld [vmem:[%s2845_s9] sm:$0xff] (!%p1451_p11)  ;;  %v1093_v1 = vld [vmem:[%s2845_s9 + $0x8] sm:$0xff] (!%p1451_p11)  ;;  %v1094_v4 = vld [vmem:[%s2845_s9 + $0x10] sm:$0xff] (!%p1451_p11) }
 0x284   : > { %v1558_v3 = vpack.c.bf16 (!%p1451_p11), %v1093_v1, %v1092_v0  ;;  %v1095_v5 = vld [vmem:[%s2845_s9 + $0x18] sm:$0xff] (!%p1451_p11) }
 0x285   : > { %v1561_v7 = vpack.c.bf16 (!%p1451_p11), %v1095_v5, %v1094_v4 }
 0x286   : > { %1559 = vmatpush3.bf16.msra.mxu0 (!%p1451_p11), %v1558_v3 }
 0x287   : > { %1560 = vmatprep.subr.bf16.mxu0 (!%p1451_p11), %v2129_v63 }
 0x28a   : > { %1562 = vmatpush3.bf16.msra.mxu0 (!%p1451_p11), %v1561_v7 }
 0x353   : > { %v973_v47 = vpop.f32.mrb[0].mxu0 }
 0x354   : > { %v1522_v48 = vpop.f32.mrb[1].mxu0  ;;  %v977_v49 = vsel %vm900_vm3, %v973_v47, -inf }
 0x355   : > { %978 = vmax.xlane.f32.xlu0 %v977_v49 }
 0x3e2   : > { %v979_v50 = vpop.xlane.xlu0 %978 }
 0x3e3   : > { %v980_v51 = vsub.f32 %v973_v47, %v979_v50 }
 0x3e5   : > { %v981_v52 = vmul.f32 1.442695, %v980_v51 }
 0x3e7   : > { %1737 = vpow2.f32 %v981_v52 }
 0x3f1   : > { %v1738_v53 = vpop.eup %1737 }
 0x3f2   : > { %v983_v54 = vsel %vm900_vm3, %v1738_v53, 0.0 }
 0x3f3   : > { %984 = vadd.xlane.f32.xlu0 %v983_v54 }
 0x480   : > { %v985_v56 = vpop.xlane.xlu0 %984 }
 0x481   : > { %1739 = vrcp.f32 %v985_v56 }
 0x48b   : > { %v1740_v57 = vpop.eup %1739 }
 0x48c   : > { %v987_v58 = vmul.f32 %v1740_v57, %v1738_v53 }
 0x48e   : > { %1526 = vmatmul.mubr.msk.f32.vlgmr.msra.gmra.mrb[0].mxu1 %vm900_vm3, %v987_v58  ;;  %1063 = vst.msk [vmem:[%s580_s17] sm:$0xff] %vm900_vm3, %v987_v58 }
 0x55c   : > { %1067 = sbr.rel (%p1451_p11) target bundleno = 1722 (0x6ba), region = 100 }
 0x561   : > { %v1057_v59 = vpop.f32.mrb[0].mxu1 }
 0x562   : > { %1062 = vst.msk [vmem:[%s1061_s16] sm:$0xff] %vm900_vm3, %v1057_v59  ;;  %v1527_v60 = vpop.f32.mrb[1].mxu1  ;;  %s2846_s16 = sld [smem:[#allocation48_spill]] (!%p1451_p11) }
 0x568   : > { %v1452_v15 = vld [vmem:[%s2846_s16] ss:$0 sm:$0xff] }
 0x569   : > { %v1070_v61 = vld [vmem:[#allocation5 + $0x8] sm:$0xff]  ;;  %v1074_v62 = vld [vmem:[#allocation5 + $0x18] sm:$0xff]  ;;  %v1072_v2 = vld [vmem:[#allocation5 + $0x10] sm:$0xff] }
 0x56a   : > { %1076 = vrot.lane.b32.xlu0 %v1070_v61, %s2128_s14  ;;  %1084 = vrot.lane.b32.xlu1 %v1074_v62, %s2130_s1  ;;  %v1068_v9 = vld [vmem:[#allocation5] sm:$0xff] }
 0x56e   : > { %1080 = vrot.lane.b32.xlu0 %v1072_v2, %s2133_s20 }
 0x5dc   : > { %v1077_v8 = vpop.permute.xlu0 %1076  ;;  %v1085_v10 = vpop.permute.xlu1 %1084 }
 0x5dd   : > { %v1087_v11 = vsel %vm900_vm3, %v1068_v9, %v1077_v8 }
 0x5e0   : > { %v1081_v12 = vpop.permute.xlu0 %1080 }
 0x5e1   : > { %v1089_v13 = vsel %vm1088_vm6, %v1087_v11, %v1081_v12 }
 0x5e2   : > { %v1091_v14 = vsel %vm1090_vm7, %v1089_v13, %v1085_v10 }
 0x5e3   : > { %1537 = vmatmul.mubr.msk.f32.vlgmr.msra.gmra.mrb[0].mxu0 %vm1103_vm8, %v1091_v14 }
 0x6b6   : > { %v1173_v16 = vpop.f32.mrb[0].mxu0 }
 0x6b7   : > { %v1174_v17 = vadd.f32 %v1452_v15, %v1173_v16  ;;  %v1538_v18 = vpop.f32.mrb[1].mxu0 }
 0x6b9   : > { %1177 = vst.msk [vmem:[%s573_s21] sm:$0xff] %vm1103_vm8, %v1174_v17 }
 0x6ba PF: > { %s2847_s14 = sld [smem:[#allocation31_spill]]  ;;  %s2848_s18 = sld [smem:[#allocation49_spill]] }
 0x6bb   : > { %s1197_s30 = sshll.u32 %s573_s21, 4  ;;  %s1179_s11 = scalar_lea.sflag [#allocation8], %s2551_s3  ;;  %s1198_s30 = int_to_ptr.vmem [resolvable:$true] %s1197_s30 }
 0x6bc   : > { %s1943_s29 = scalar_lea.vmem %s1198_s30, 128  ;;  %p2849_p4 = scmp.ne.s32.totalorder %s2813_s19, 0 }
 0x6bd   : > { %p1944_p5 = scmp.ne.s32.totalorder %s1198_s30, %s1943_s29  ;;  %s2134_s10 = smov [#allocation18]  }
 0x6be   : > { %s1947_s20 = sshll.u32 %s2134_s10, 4  ;;  %s1948_s20 = int_to_ptr.vmem [resolvable:$false] %s1947_s20 }
 0x6bf   : > { %p1945_p0 = pnand %p1944_p5, %p2849_p4  ;;  %s1949_s6 = scalar_lea.vmem %s1948_s20, 256 }
 0x6c0   : > { %s1456_s4 = sshll.u32 %s2847_s14, 7  ;;  %p1950_p3 = scmp.lt.s32.totalorder %s1198_s30, %s1948_s20 }
 0x6c1   : > { %s2651_s1 = scalar_lea.hbm %s2848_s18, %s1456_s4  ;;  %p1946_p1 = pneg %p1945_p0 }
 0x6c2   : > { %p1951_p12 = scmp.lt.s32.totalorder %s1949_s6, %s1943_s29 }
 0x6c4   : > { %p1952_p8 = por %p1951_p12, %p1950_p3 }
 0x6c6   : > { %p1953_p7 = pnand %p1952_p8, %p1946_p1 }
 0x6c8   : > { %1956 = shalt.err (!%p1953_p7)
}
 0x6c9   : > { %s1957_s3 = scalar_lea.hbm %s2651_s1, 128  ;;  %s1961_s24 = scalar_lea.hbm %s2848_s18, 256 }
 0x6ca   : > { %p1958_p13 = scmp.ne.s32.totalorder %s2651_s1, %s1957_s3  ;;  %p1962_p6 = scmp.lt.u32.totalorder %s2651_s1, %s2848_s18 }
 0x6cb   : > { %p1963_p9 = scmp.lt.u32.totalorder %s1961_s24, %s1957_s3  ;;  %p1965_p5 = scmp.lt.u32.totalorder %s1957_s3, %s2651_s1 }
 0x6cc   : > { %p1959_p10 = pnand %p1958_p13, %p2849_p4 }
 0x6cd   : > { %p1964_p11 = por %p1963_p9, %p1962_p6 }
 0x6ce   : > { %p1960_p2 = pneg %p1959_p10 }
 0x6cf   : > { %p1966_p0 = por %p1965_p5, %p1964_p11 }
 0x6d1   : > { %p1967_p1 = pnand %p1966_p0, %p1960_p2 }
 0x6d3   : > { %1970 = shalt.err (!%p1967_p1)
}
 0x6d4   : > { %s2850_s2 = sld [smem:[#allocation30_spill]]  ;;  %s1457_s23 = sshll.u32 %s2847_s14, 2 }
 0x6d5   : > { %1585 = dma.vmem_to_hbm [thread:$0]  (%p2849_p4), %s1198_s30, 128, %s2651_s1, %s1179_s11  }
 0x6d6   : > { %s1212_s29 = sshll.u32 %s580_s17, 4  ;;  %s2851_s19 = sld [smem:[#allocation50_spill]]  ;;  %s2677_s29 = int_to_ptr.vmem [resolvable:$true] %s1212_s29 }
 0x6d7   : > { %s1184_s21 = scalar_lea.sflag [#allocation20], %s578_s27  ;;  %s1971_s24 = scalar_lea.vmem %s2677_s29, 128 }
 0x6d8   : > { %p1972_p3 = scmp.ne.s32.totalorder %s2677_s29, %s1971_s24  ;;  %p2852_p12 = scmp.ne.s32.totalorder %s2819_s7, 0 }
 0x6d9   : > { %s2135_s28 = smov [#allocation19]  }
 0x6da   : > { %s1208_s10 = sadd.s32 %s2850_s2, %s1457_s23  ;;  %p1973_p4 = pnand %p1972_p3, %p2852_p12 }
 0x6db   : > { %s1458_s20 = sshll.u32 %s1208_s10, 7  ;;  %s1975_s17 = sshll.u32 %s2135_s28, 4  ;;  %s1976_s17 = int_to_ptr.vmem [resolvable:$false] %s1975_s17 }
 0x6dc   : > { %s1210_s15 = scalar_lea.hbm %s2851_s19, %s1458_s20  ;;  %p1974_p8 = pneg %p1973_p4 }
 0x6dd   : > { %s1977_s14 = scalar_lea.vmem %s1976_s17, 256  ;;  %p1978_p7 = scmp.lt.s32.totalorder %s2677_s29, %s1976_s17 }
 0x6de   : > { %p1979_p13 = scmp.lt.s32.totalorder %s1977_s14, %s1971_s24 }
 0x6e0   : > { %p1980_p10 = por %p1979_p13, %p1978_p7 }
 0x6e2   : > { %p1981_p2 = pnand %p1980_p10, %p1974_p8 }
 0x6e4   : > { %1984 = shalt.err (!%p1981_p2)
}
 0x6e5   : > { %s1985_s1 = scalar_lea.hbm %s1210_s15, 128  ;;  %s1989_s11 = scalar_lea.hbm %s2851_s19, 1024 }
 0x6e6   : > { %p1986_p6 = scmp.ne.s32.totalorder %s1210_s15, %s1985_s1  ;;  %p1990_p5 = scmp.lt.u32.totalorder %s1210_s15, %s2851_s19 }
 0x6e7   : > { %p1991_p0 = scmp.lt.u32.totalorder %s1989_s11, %s1985_s1  ;;  %p1993_p3 = scmp.lt.u32.totalorder %s1985_s1, %s1210_s15 }
 0x6e8   : > { %p1987_p9 = pnand %p1986_p6, %p2852_p12 }
 0x6e9   : > { %p1992_p1 = por %p1991_p0, %p1990_p5 }
 0x6ea   : > { %p1988_p11 = pneg %p1987_p9 }
 0x6eb   : > { %p1994_p4 = por %p1993_p3, %p1992_p1 }
 0x6ed   : > { %p1995_p8 = pnand %p1994_p4, %p1988_p11 }
 0x6ef   : > { %1998 = shalt.err (!%p1995_p8)
}
 0x6f0   : > { %1586 = dma.vmem_to_hbm [thread:$0]  (%p2852_p12), %s2677_s29, 128, %s1210_s15, %s1184_s21  }
 0x6f1 PF: > { %s2853_s2 = sld [smem:[#allocation29_spill]]  ;;  %s2854_s23 = sld [smem:[#allocation37_spill]] }
 0x6f2   : > { %p1628_p7 = scmp.ge.s32.totalorder %s2109_s13, 2 }
 0x6f7   : > { %s1224_s10 = sand.u32 1, %s2853_s2   ;;  %p2855_p13 = scmp.ne.s32.totalorder %s2854_s23, 0 }
 0x6f8   : > { %s1225_s20 = scalar_lea.sflag [#allocation8], %s1224_s10 }
 0x6f9   : > { %p1613_p10 = pnand %p1628_p7, %p2855_p13 }
 0x6fb   : > { %2060 = dma.done.wait (!%p1613_p10), %s1225_s20, 128  }
 0x6fc   : > { %2062 = vsyncadd (!%p1613_p10), %s1225_s20, 4294967168  ;;  %s2856_s6 = sld [smem:[#allocation27_spill]]  ;;  %s2857_s3 = sld [smem:[#allocation40_spill]] }
 0x702   : > { %s1233_s24 = sand.u32 1, %s2856_s6   ;;  %p2858_p2 = scmp.ne.s32.totalorder %s2857_s3, 0 }
 0x703   : > { %s1234_s28 = scalar_lea.sflag [#allocation20], %s1233_s24 }
 0x704   : > { %p1616_p6 = pnand %p1628_p7, %p2858_p2 }
 0x706   : > { %2064 = dma.done.wait (!%p1616_p6), %s1234_s28, 128  }
 0x707   : > { %2066 = vsyncadd (!%p1616_p6), %s1234_s28, 4294967168  ;;  %s37_s13 = sadd.s32 1, %s2109_s13   ;;  %s2859_s7 = sld [smem:[#allocation28_spill]] }
 0x708   : > { %p34_p12 = scmp.ge.s32.totalorder %s37_s13, 10   ;;  %s2860_s23 = sld [smem:[#allocation39_spill]] }
 0x709   : > { %s2861_s29 = sld [smem:[#allocation38_spill]]  ;;  %s2862_s27 = sld [smem:[#allocation32_spill]] }
 0x70a   : > { %s2863_s28 = sld [smem:[#allocation33_spill]]  ;;  %s2864_s15 = sld [smem:[#allocation35_spill]] }
 0x70b   : > { %s2865_s30 = sld [smem:[#allocation36_spill]]  ;;  %s2866_s21 = smov %s2073_s22 }
 0x70c   : > { %s2868_s24 = smov %s2085_s25  ;;  %s2869_s25 = smov %s2089_s26 }
 0x70d   : > { %s2867_s22 = smov %s2859_s7  ;;  %36 = sbr.rel (!%p34_p12) target bundleno = 26 (0x1a), region = 190 }
 0x70f   : > { %s2870_s26 = smov %s2861_s29 }
 0x710   : > { %s2871_s29 = smov %s2864_s15 }
 0x714   :  { %1239 = vsyncpa [#allocation7], 1 }
 0x715   :  { %1241 = vsyncpa [#allocation7 + $0x1], 1 }
 0x716   :  { %1242 = vsyncpa [#allocation10], 1 }
 0x717   :  { %1244 = vsyncpa [#allocation10 + $0x1], 1 }
 0x718   :  { %1245 = vsyncpa [#allocation13], 1 }
 0x719   :  { %1246 = vsyncpa [#allocation16], 1 }
 0x71a   :  { %1247 = vsyncpa [#allocation8], 1 }
 0x71b   :  { %1249 = vsyncpa [#allocation8 + $0x1], 1 }
 0x71c   :  { %1250 = vsyncpa [#allocation20], 1 }
 0x71d   :  { %1252 = vsyncpa [#allocation20 + $0x1], 1 }

// kernel: tpu_custom_call.1
= control target key start
LH: loop header
LB: loop body
LE: loop exit
PB: predicated region body
PF: predicated region fallthrough
CT: control target
= control target key end

     0   :  { %s2740_s0 = inlined_call_operand.hbm [shape: f32[2,8,32], index: 0, kind: input, shape index: {}]   ;;  %s2741_s1 = inlined_call_operand.hbm [shape: f32[2,8,32], index: 1, kind: input, shape index: {}]   ;;  %s2742_s2 = inlined_call_operand.hbm [shape: f32[2,8,32], index: 2, kind: input, shape index: {}]   ;;  %s2743_s3 = inlined_call_operand.hbm [shape: f32[32,32], index: 3, kind: input, shape index: {}]   ;;  %s2744_s4 = inlined_call_operand.vmem [shape: f32[1,32], index: 4, kind: input, shape index: {}]   ;;  %s2745_s5 = inlined_call_operand.hbm [shape: f32[32,32], index: 5, kind: input, shape index: {}]   ;;  %s2746_s6 = inlined_call_operand.vmem [shape: f32[1,32], index: 6, kind: input, shape index: {}]   ;;  %s2747_s7 = inlined_call_operand.hbm [shape: f32[32,32], index: 7, kind: input, shape index: {}]   ;;  %s2748_s8 = inlined_call_operand.hbm [shape: f32[1,32], index: 8, kind: input, shape index: {}]   ;;  %s2749_s9 = inlined_call_operand.vmem [shape: f32[32,32], index: 9, kind: input, shape index: {}]   ;;  %s2750_s10 = inlined_call_operand.vmem [shape: f32[1,32], index: 10, kind: input, shape index: {}]   ;;  %s2751_s11 = inlined_call_operand.hbm [shape: f32[2,8,32], index: 11, kind: output, shape index: {0}]   ;;  %s2752_s12 = inlined_call_operand.hbm [shape: f32[2,4,8,8], index: 12, kind: output, shape index: {1}]  }
   0x1   :  { %2785 = sst [smem:[#allocation41_spill]] %s2741_s1 }
   0x2   :  { %2786 = sst [smem:[#allocation42_spill]] %s2742_s2 }
   0x3   :  { %2787 = sst [smem:[#allocation43_spill]] %s2743_s3 }
   0x4   :  { %2788 = sst [smem:[#allocation44_spill]] %s2744_s4 }
   0x5   :  { %2789 = sst [smem:[#allocation45_spill]] %s2746_s6 }
   0x6   :  { %2790 = sst [smem:[#allocation46_spill]] %s2747_s7 }
   0x7   :  { %2791 = sst [smem:[#allocation47_spill]] %s2749_s9 }
   0x8   :  { %2792 = sst [smem:[#allocation48_spill]] %s2750_s10 }
   0x9   :  { %2793 = sst [smem:[#allocation49_spill]] %s2751_s11 }
   0xa   :  { %2794 = sst [smem:[#allocation50_spill]] %s2752_s12 }
   0xb   :  { %18 = vsyncpa [#allocation7], 0 }
   0xc   :  { %20 = vsyncpa [#allocation7 + $0x1], 0 }
   0xd   :  { %21 = vsyncpa [#allocation10], 0 }
   0xe   :  { %23 = vsyncpa [#allocation10 + $0x1], 0 }
   0xf   :  { %24 = vsyncpa [#allocation13], 0 }
  0x10   :  { %25 = vsyncpa [#allocation16], 0 }
  0x11   :  { %26 = vsyncpa [#allocation8], 0 }
  0x12   :  { %28 = vsyncpa [#allocation8 + $0x1], 0 }
  0x13   :  { %29 = vsyncpa [#allocation20], 0 }
  0x14   :  { %31 = vsyncpa [#allocation20 + $0x1], 0  ;;  %s2201_s21 = smov 0   ;;  %s2203_s22 = smov 0  }
  0x15   :  { %s2205_s23 = smov 0   ;;  %s2207_s24 = smov 0  }
  0x16   :  { %s2209_s25 = smov 0   ;;  %s2211_s26 = smov 0  }
  0x17   :  { %s2213_s27 = smov 0   ;;  %s2215_s28 = smov 0  }
  0x18   :  { %s2217_s29 = smov 0   ;;  %s2219_s30 = smov 0  }
  0x19   :  { %s2221_s13 = smov 0  }
  0x1a LB: > { %2795 = sst [smem:[#allocation27_spill]] %s2069_s21  ;;  %s2257_s14 = sadd.s32 4294967295, %s2109_s13   ;;  %s2109_s13 = sphi %s2221_s13, %s37_s13   ;;  %s2105_s30 = sphi %s2219_s30, %s2865_s30   ;;  %s2101_s29 = sphi %s2217_s29, %s2871_s29   ;;  %s2097_s28 = sphi %s2215_s28, %s2863_s28   ;;  %s2093_s27 = sphi %s2213_s27, %s2862_s27   ;;  %s2089_s26 = sphi %s2211_s26, %s2870_s26   ;;  %s2085_s25 = sphi %s2209_s25, %s2869_s25   ;;  %s2081_s24 = sphi %s2207_s24, %s2868_s24   ;;  %s2077_s23 = sphi %s2205_s23, %s2860_s23   ;;  %s2073_s22 = sphi %s2203_s22, %s2867_s22   ;;  %s2069_s21 = sphi %s2201_s21, %s2866_s21  }
  0x1b   : > { %2796 = sst [smem:[#allocation28_spill]] %s2077_s23  ;;  %p1418_p0 = scmp.ge.s32.totalorder %s2109_s13, 1 }
  0x1c   : > { %2797 = sst [smem:[#allocation29_spill]] %s2081_s24  ;;  %p2757_p1 = scmp.eq.s32.totalorder %s2257_s14, 0 }
  0x1d   : > { %2798 = sst [smem:[#allocation30_spill]] %s2093_s27  ;;  %p354_p2 = scmp.lt.s32.totalorder %s2109_s13, 9 }
  0x1e   : > { %2799 = sst [smem:[#allocation31_spill]] %s2097_s28  ;;  %s2111_s16 = smov [#allocation12]  }
  0x1f   : > { %2800 = sst [smem:[#allocation32_spill]] %s2101_s29  ;;  %p2262_p3 = pnand %p1418_p0, %p354_p2 }
  0x20   : > { %2801 = sst [smem:[#allocation33_spill]] %s2105_s30  ;;  %s366_s17 = sshll.u32 %s2111_s16, 4  ;;  %s367_s17 = int_to_ptr.vmem [resolvable:$true] %s366_s17 }
  0x21   : > { %s2802_s15 = scalar_select %p2262_p3, 1, 0 }
  0x22   : > { %p1589_p4 = pneg %p2262_p3  ;;  %s2112_s19 = smov [#allocation15]  }
  0x23   : > { %2803 = sst [smem:[#allocation34_spill]] %s2802_s15  ;;  %s398_s20 = sshll.u32 %s2112_s19, 4  ;;  %s2274_s20 = int_to_ptr.vmem [resolvable:$true] %s398_s20 }
  0x24   : > { %p2270_p5 = pnand %p1589_p4, %p2757_p1  ;;  %s2805_s3 = sld [smem:[#allocation43_spill]] }
  0x26   : > { %s2804_s18 = scalar_select %p2270_p5, 1, 0 }
  0x27   : > { %p2284_p7 = pneg %p2270_p5 }
  0x29   : > { %s2806_s16 = scalar_select %p2284_p7, 1, 0 }
  0x2a   : > { %s1741_s28 = scalar_lea.hbm %s2805_s3, 512 }
  0x2b   : > { %p1742_p6 = scmp.ne.s32.totalorder %s2805_s3, %s1741_s28  ;;  %p1748_p10 = scmp.lt.u32.totalorder %s1741_s28, %s2805_s3 }
  0x2d   : > { %p1744_p8 = pnand %p2284_p7, %p1742_p6 }
  0x2f   : > { %p1745_p9 = pneg %p1744_p8 }
  0x31   : > { %p1750_p11 = pnand %p1748_p10, %p1745_p9 }
  0x33   : > { %1753 = shalt.err (!%p1750_p11)
}
  0x34   : > { %s1754_s11 = scalar_lea.vmem %s367_s17, 512  ;;  %p1762_p2 = scmp.lt.s32.totalorder %s367_s17, %s367_s17 }
  0x35   : > { %p1755_p12 = scmp.ne.s32.totalorder %s367_s17, %s1754_s11  ;;  %p1763_p4 = scmp.lt.s32.totalorder %s1754_s11, %s1754_s11 }
  0x37   : > { %p1757_p13 = pnand %p1755_p12, %p2284_p7  ;;  %p1764_p1 = por %p1763_p4, %p1762_p2 }
  0x39   : > { %p1758_p0 = pneg %p1757_p13 }
  0x3b   : > { %p1765_p3 = pnand %p1764_p1, %p1758_p0 }
  0x3d   : > { %1768 = shalt.err (!%p1765_p3)
}
  0x3e   : > { %s2762_s9 = smov 128   ;;  %s2763_s10 = smov 8  }
  0x3f   : > { %1592 = dma.hbm_to_vmem [thread:$0]  (!%p2270_p5), %s2805_s3, 512, %s367_s17, [#allocation13], %s2762_s9, %s2762_s9, %s2763_s10  }
  0x40   : > { %s2807_s7 = sld [smem:[#allocation46_spill]] }
  0x46   : > { %s1769_s4 = scalar_lea.hbm %s2807_s7, 512 }
  0x47   : > { %p1770_p1 = scmp.ne.s32.totalorder %s2807_s7, %s1769_s4  ;;  %p1776_p8 = scmp.lt.u32.totalorder %s1769_s4, %s2807_s7 }
  0x49   : > { %p1772_p3 = pnand %p1770_p1, %p2284_p7 }
  0x4b   : > { %p1773_p6 = pneg %p1772_p3 }
  0x4d   : > { %p1778_p9 = pnand %p1776_p8, %p1773_p6 }
  0x4f   : > { %1781 = shalt.err (!%p1778_p9)
}
  0x50   : > { %s1782_s17 = scalar_lea.vmem %s2274_s20, 512  ;;  %p1790_p13 = scmp.lt.s32.totalorder %s2274_s20, %s2274_s20 }
  0x51   : > { %p1783_p10 = scmp.ne.s32.totalorder %s2274_s20, %s1782_s17  ;;  %p1791_p0 = scmp.lt.s32.totalorder %s1782_s17, %s1782_s17 }
  0x53   : > { %p1785_p11 = pnand %p1783_p10, %p2284_p7  ;;  %p1792_p2 = por %p1791_p0, %p1790_p13 }
  0x55   : > { %p1786_p12 = pneg %p1785_p11 }
  0x57   : > { %p1793_p4 = pnand %p1792_p2, %p1786_p12 }
  0x59   : > { %1796 = shalt.err (!%p1793_p4)
}
  0x5a   : > { %1598 = dma.hbm_to_vmem [thread:$0]  (!%p2270_p5), %s2807_s7, 512, %s2274_s20, [#allocation16], %s2762_s9, %s2762_s9, %s2763_s10  }
  0x5b   : > { %s1417_s27 = sadd.s32 4294967294, %s2109_s13   ;;  %s46_s15 = sadd.s32 1, %s2101_s29 }
  0x5c   : > { %p47_p1 = scmp.ge.s32.totalorder %s46_s15, 4  ;;  %s49_s6 = sadd.s32 1, %s2105_s30 }
  0x5d   : > { %s56_s12 = sadd.s32 1, %s2089_s26  ;;  %p63_p3 = scmp.ne.s32.totalorder %s2089_s26, %s2085_s25 }
  0x5e   : > { %s2873_s15 = smov (%p47_p1, %s46_s15), 0  ;;  %s2875_s6 = smov (!%p47_p1, %s49_s6), %s2105_s30 }
  0x5f   : > { %2808 = sst [smem:[#allocation35_spill]] %s2873_s15  ;;  %p64_p6 = scmp.eq.s32.totalorder %s2109_s13, 0 }
  0x60   : > { %p69_p8 = scmp.ne.s32.totalorder %s2085_s25, %s2081_s24  ;;  %p51_p9 = scmp.ge.s32.totalorder %s2875_s6, 2 }
  0x61   : > { %p313_p10 = scmp.eq.s32.totalorder %s2257_s14, 7  ;;  %p2342_p11 = por %p64_p6, %p63_p3 }
  0x62   : > { %p2810_p12 = scmp.eq.s32.totalorder %s2257_s14, 0  ;;  %s2877_s6 = smov (%p51_p9, %s2875_s6), 0 }
  0x63   : > { %2812 = sst [smem:[#allocation36_spill]] %s2877_s6  ;;  %p2356_p0 = por %p313_p10, %p63_p3 }
  0x64   : > { %p2348_p13 = por %p2810_p12, %p69_p8  ;;  %p2360_p2 = scmp.eq.s32.totalorder %s1417_s27, 7 }
  0x65   : > { %s2813_s19 = scalar_select %p2356_p0, 1, 0 }
  0x66   : > { %s2811_s28 = scalar_select %p2348_p13, 1, 0 }
  0x67   : > { %s53_s17 = ssub.s32 %s2105_s30, %s2877_s6  ;;  %s326_s2 = ssub.s32 %s2101_s29, %s2873_s15 }
  0x68   : > { %p54_p4 = scmp.eq.s32.totalorder %s53_s17, 0  ;;  %p2370_p1 = por %p2360_p2, %p69_p8 }
  0x69   : > { %s327_s9 = sor.u32 %s326_s2, %s53_s17  ;;  %s330_s10 = sadd.s32 1, %s2077_s23 }
  0x6a   : > { %s2815_s4 = scalar_select %p2370_p1, 1, 0 }
  0x6b   : > { %s2376_s27 = scalar_select %p54_p4, %s2089_s26, %s56_s12  }
  0x6c   : > { %2816 = sst [smem:[#allocation37_spill]] %s2815_s4  ;;  %p328_p3 = scmp.eq.s32.totalorder %s327_s9, 0 }
  0x6d   : > { %2817 = sst [smem:[#allocation38_spill]] %s2376_s27  ;;  %p340_p6 = scmp.ne.s32.totalorder %s2077_s23, %s2073_s22 }
  0x6e   : > { %p346_p9 = scmp.ne.s32.totalorder %s2073_s22, %s2069_s21  ;;  %p1623_p12 = scmp.lt.s32.totalorder %s2109_s13, 8 }
  0x6f   : > { %s2384_s3 = scalar_select %p328_p3, %s2077_s23, %s330_s10  }
  0x70   : > { %p2388_p0 = por %p340_p6, %p313_p10  ;;  %p2394_p8 = por %p346_p9, %p2360_p2 }
  0x71   : > { %2818 = sst [smem:[#allocation39_spill]] %s2384_s3  ;;  %s2769_s17 = sand.u32 1, %s2089_s26  }
  0x72   : > { %s2819_s7 = scalar_select %p2388_p0, 1, 0 }
  0x73   : > { %s2820_s6 = scalar_select %p2394_p8, 1, 0 }
  0x74   : > { %s2400_s2 = sshll.u32 %s2105_s30, 7  ;;  %s2404_s9 = sshll.u32 %s2769_s17, 3 }
  0x75   : > { %2821 = sst [smem:[#allocation40_spill]] %s2820_s6  ;;  %p2408_p4 = pnand %p1623_p12, %p2342_p11 }
  0x76   : > { %s447_s12 = sand.u32 1, %s2109_s13   ;;  %s2823_s1 = sld [smem:[#allocation41_spill]] }
  0x77   : > { %s2822_s10 = scalar_select %p2408_p4, 1, 0 }
  0x78   : > { %s451_s30 = scalar_lea.vmem [#allocation9], %s2404_s9  ;;  %s2422_s20 = scalar_lea.sflag [#allocation10], %s447_s12 }
  0x79   : > { %s458_s17 = sshll.u32 %s451_s30, 4  ;;  %p2428_p11 = pneg %p2408_p4  ;;  %s2420_s17 = int_to_ptr.vmem [resolvable:$true] %s458_s17 }
  0x7b   : > { %s2824_s3 = scalar_select %p2428_p11, 1, 0 }
  0x7c   : > { %s2417_s29 = scalar_lea.hbm %s2823_s1, %s2400_s2  ;;  %s1802_s23 = scalar_lea.hbm %s2823_s1, 256 }
  0x7d   : > { %s1797_s27 = scalar_lea.hbm %s2417_s29, 128  ;;  %p1803_p6 = scmp.lt.u32.totalorder %s2417_s29, %s2823_s1 }
  0x7e   : > { %p1798_p10 = scmp.ne.s32.totalorder %s2417_s29, %s1797_s27  ;;  %p1804_p9 = scmp.lt.u32.totalorder %s1802_s23, %s1797_s27 }
  0x7f   : > { %p1806_p8 = scmp.lt.u32.totalorder %s1797_s27, %s2417_s29 }
  0x80   : > { %p1800_p2 = pnand %p2428_p11, %p1798_p10  ;;  %p1805_p12 = por %p1804_p9, %p1803_p6 }
  0x82   : > { %p1801_p3 = pneg %p1800_p2  ;;  %p1807_p1 = por %p1806_p8, %p1805_p12 }
  0x84   : > { %p1808_p0 = pnand %p1807_p1, %p1801_p3 }
  0x86   : > { %1811 = shalt.err (!%p1808_p0)
}
  0x87   : > { %s1812_s12 = scalar_lea.vmem %s2420_s17, 128  ;;  %s2115_s15 = smov [#allocation9]  }
  0x88   : > { %p1813_p10 = scmp.ne.s32.totalorder %s2420_s17, %s1812_s12  ;;  %s1817_s11 = sshll.u32 %s2115_s15, 4  ;;  %s1818_s11 = int_to_ptr.vmem [resolvable:$false] %s1817_s11 }
  0x89   : > { %s1819_s6 = scalar_lea.vmem %s1818_s11, 256  ;;  %p1820_p5 = scmp.lt.s32.totalorder %s2420_s17, %s1818_s11 }
  0x8a   : > { %p1815_p2 = pnand %p1813_p10, %p2428_p11  ;;  %p1821_p7 = scmp.lt.s32.totalorder %s1819_s6, %s1812_s12 }
  0x8c   : > { %p1816_p13 = pneg %p1815_p2  ;;  %p1822_p6 = por %p1821_p7, %p1820_p5 }
  0x8e   : > { %p1823_p9 = pnand %p1822_p6, %p1816_p13 }
  0x90   : > { %1826 = shalt.err (!%p1823_p9)
}
  0x91   : > { %1608 = dma.hbm_to_vmem [thread:$0]  (!%p2408_p4), %s2417_s29, 128, %s2420_s17, %s2422_s20  }
  0x92   : > { %s2116_s23 = smov [#allocation14]   ;;  %s2117_s30 = smov [#allocation17]  }
  0x93   : > { %s382_s27 = sshll.u32 %s2116_s23, 4  ;;  %s412_s1 = sshll.u32 %s2117_s30, 4  ;;  %s383_s27 = int_to_ptr.vmem [resolvable:$true] %s382_s27  ;;  %s413_s1 = int_to_ptr.vmem [resolvable:$true] %s412_s1 }
  0x94   : > { %s1827_s11 = scalar_lea.hbm %s2745_s5, 512  ;;  %p2825_p7 = scmp.ne.s32.totalorder %s2806_s16, 0 }
  0x95   : > { %p1828_p5 = scmp.ne.s32.totalorder %s2745_s5, %s1827_s11  ;;  %p1834_p1 = scmp.lt.u32.totalorder %s1827_s11, %s2745_s5 }
  0x97   : > { %p1830_p13 = pnand %p1828_p5, %p2825_p7 }
  0x99   : > { %p1831_p0 = pneg %p1830_p13 }
  0x9b   : > { %p1836_p8 = pnand %p1834_p1, %p1831_p0 }
  0x9d   : > { %1839 = shalt.err (!%p1836_p8)
}
  0x9e   : > { %s1840_s29 = scalar_lea.vmem %s383_s27, 512  ;;  %p1848_p2 = scmp.lt.s32.totalorder %s383_s27, %s383_s27 }
  0x9f   : > { %p1841_p3 = scmp.ne.s32.totalorder %s383_s27, %s1840_s29  ;;  %p1849_p6 = scmp.lt.s32.totalorder %s1840_s29, %s1840_s29 }
  0xa1   : > { %p1843_p12 = pnand %p1841_p3, %p2825_p7  ;;  %p1850_p9 = por %p1849_p6, %p1848_p2 }
  0xa3   : > { %p1844_p10 = pneg %p1843_p12 }
  0xa5   : > { %p1851_p4 = pnand %p1850_p9, %p1844_p10 }
  0xa7   : > { %1854 = shalt.err (!%p1851_p4)
}
  0xa8   : > { %p2826_p5 = scmp.ne.s32.totalorder %s2804_s18, 0  ;;  %s2827_s21 = smov 8  }
  0xa9   : > { %s2828_s17 = smov 128   ;;  %s1855_s15 = scalar_lea.hbm %s2748_s8, 16 }
  0xaa   : > { %1595 = dma.hbm_to_vmem [thread:$0]  (!%p2826_p5), %s2745_s5, 512, %s383_s27, [#allocation13], %s2828_s17, %s2828_s17, %s2827_s21  }
  0xab   : > { %p1856_p13 = scmp.ne.s32.totalorder %s2748_s8, %s1855_s15  ;;  %p1862_p1 = scmp.lt.u32.totalorder %s1855_s15, %s2748_s8 }
  0xad   : > { %p1858_p4 = pnand %p1856_p13, %p2825_p7 }
  0xaf   : > { %p1859_p0 = pneg %p1858_p4 }
  0xb1   : > { %p1864_p8 = pnand %p1862_p1, %p1859_p0 }
  0xb3   : > { %1867 = shalt.err (!%p1864_p8)
}
  0xb4   : > { %s1868_s24 = scalar_lea.vmem %s413_s1, 16  ;;  %s1875_s27 = scalar_lea.vmem %s413_s1, 32 }
  0xb5   : > { %p1869_p3 = scmp.ne.s32.totalorder %s413_s1, %s1868_s24  ;;  %p1876_p2 = scmp.lt.s32.totalorder %s413_s1, %s413_s1 }
  0xb6   : > { %p1877_p6 = scmp.lt.s32.totalorder %s1875_s27, %s1868_s24 }
  0xb7   : > { %p1871_p12 = pnand %p1869_p3, %p2825_p7 }
  0xb8   : > { %p1878_p9 = por %p1877_p6, %p1876_p2 }
  0xb9   : > { %p1872_p10 = pneg %p1871_p12 }
  0xbb   : > { %p1879_p11 = pnand %p1878_p9, %p1872_p10 }
  0xbd   : > { %1882 = shalt.err (!%p1879_p11)
}
  0xbe   : > { %1601 = dma.hbm_to_vmem [thread:$0]  (!%p2826_p5), %s2748_s8, 16, %s413_s1, [#allocation16]  }
  0xbf   : > { %s2495_s23 = scalar_lea.hbm %s2740_s0, %s2400_s2  ;;  %s433_s30 = scalar_lea.vmem [#allocation6], %s2404_s9 }
  0xc0   : > { %s440_s18 = sshll.u32 %s433_s30, 4  ;;  %s2829_s12 = sld [smem:[#allocation42_spill]]  ;;  %s2498_s18 = int_to_ptr.vmem [resolvable:$true] %s440_s18 }
  0xc1   : > { %s2830_s29 = sand.u32 1, %s2089_s26   ;;  %s1883_s24 = scalar_lea.hbm %s2495_s23, 128 }
  0xc2   : > { %s430_s1 = scalar_lea.sflag [#allocation7], %s2830_s29  ;;  %p1884_p11 = scmp.ne.s32.totalorder %s2495_s23, %s1883_s24 }
  0xc3   : > { %p2831_p7 = scmp.ne.s32.totalorder %s2824_s3, 0  ;;  %s1888_s17 = scalar_lea.hbm %s2740_s0, 256 }
  0xc4   : > { %p1889_p4 = scmp.lt.u32.totalorder %s2495_s23, %s2740_s0  ;;  %p1890_p0 = scmp.lt.u32.totalorder %s1888_s17, %s1883_s24 }
  0xc5   : > { %p1886_p5 = pnand %p1884_p11, %p2831_p7  ;;  %p1892_p8 = scmp.lt.u32.totalorder %s1883_s24, %s2495_s23 }
  0xc6   : > { %s2504_s6 = scalar_lea.hbm %s2829_s12, %s2400_s2  ;;  %p1891_p1 = por %p1890_p0, %p1889_p4 }
  0xc7   : > { %p1887_p13 = pneg %p1886_p5 }
  0xc8   : > { %p1893_p3 = por %p1892_p8, %p1891_p1 }
  0xca   : > { %p1894_p12 = pnand %p1893_p3, %p1887_p13 }
  0xcc   : > { %1897 = shalt.err (!%p1894_p12)
}
  0xcd   : > { %s1898_s2 = scalar_lea.vmem %s2498_s18, 128  ;;  %s2118_s30 = smov [#allocation6]  }
  0xce   : > { %p1899_p10 = scmp.ne.s32.totalorder %s2498_s18, %s1898_s2  ;;  %s1903_s15 = sshll.u32 %s2118_s30, 4  ;;  %s1904_s15 = int_to_ptr.vmem [resolvable:$false] %s1903_s15 }
  0xcf   : > { %s1905_s11 = scalar_lea.vmem %s1904_s15, 256  ;;  %p1906_p9 = scmp.lt.s32.totalorder %s2498_s18, %s1904_s15 }
  0xd0   : > { %p1901_p2 = pnand %p1899_p10, %p2831_p7  ;;  %p1907_p11 = scmp.lt.s32.totalorder %s1905_s11, %s1898_s2 }
  0xd2   : > { %p1902_p6 = pneg %p1901_p2  ;;  %p1908_p5 = por %p1907_p11, %p1906_p9 }
  0xd4   : > { %p1909_p4 = pnand %p1908_p5, %p1902_p6 }
  0xd6   : > { %1912 = shalt.err (!%p1909_p4)
}
  0xd7   : > { %p2832_p13 = scmp.ne.s32.totalorder %s2822_s10, 0  ;;  %s469_s29 = scalar_lea.vmem [#allocation11], %s2404_s9 }
  0xd8   : > { %s476_s24 = sshll.u32 %s469_s29, 4  ;;  %s1913_s27 = scalar_lea.hbm %s2504_s6, 128  ;;  %s477_s24 = int_to_ptr.vmem [resolvable:$true] %s476_s24 }
  0xd9   : > { %1605 = dma.hbm_to_vmem [thread:$0]  (!%p2832_p13), %s2495_s23, 128, %s2498_s18, %s430_s1  }
  0xda   : > { %p1914_p0 = scmp.ne.s32.totalorder %s2504_s6, %s1913_s27  ;;  %s1918_s16 = scalar_lea.hbm %s2829_s12, 256 }
  0xdb   : > { %p1919_p3 = scmp.lt.u32.totalorder %s2504_s6, %s2829_s12  ;;  %p1920_p12 = scmp.lt.u32.totalorder %s1918_s16, %s1913_s27 }
  0xdc   : > { %p1916_p1 = pnand %p1914_p0, %p2831_p7  ;;  %p1922_p2 = scmp.lt.u32.totalorder %s1913_s27, %s2504_s6 }
  0xdd   : > { %p1921_p10 = por %p1920_p12, %p1919_p3 }
  0xde   : > { %p1917_p8 = pneg %p1916_p1 }
  0xdf   : > { %p1923_p6 = por %p1922_p2, %p1921_p10 }
  0xe1   : > { %p1924_p9 = pnand %p1923_p6, %p1917_p8 }
  0xe3   : > { %1927 = shalt.err (!%p1924_p9)
}
  0xe4   : > { %s1928_s9 = scalar_lea.vmem %s477_s24, 128  ;;  %s2119_s23 = smov [#allocation11]  }
  0xe5   : > { %p1929_p11 = scmp.ne.s32.totalorder %s477_s24, %s1928_s9  ;;  %s1933_s18 = sshll.u32 %s2119_s23, 4  ;;  %s1934_s18 = int_to_ptr.vmem [resolvable:$false] %s1933_s18 }
  0xe6   : > { %s1935_s1 = scalar_lea.vmem %s1934_s18, 256  ;;  %p1936_p0 = scmp.lt.s32.totalorder %s477_s24, %s1934_s18 }
  0xe7   : > { %p1931_p5 = pnand %p1929_p11, %p2831_p7  ;;  %p1937_p1 = scmp.lt.s32.totalorder %s1935_s1, %s1928_s9 }
  0xe9   : > { %p1932_p4 = pneg %p1931_p5  ;;  %p1938_p13 = por %p1937_p1, %p1936_p0 }
  0xeb   : > { %p1939_p3 = pnand %p1938_p13, %p1932_p4 }
  0xed   : > { %1942 = shalt.err (!%p1939_p3)
}
  0xee   : > { %p2833_p12 = scmp.ne.s32.totalorder %s2822_s10, 0  ;;  %s2834_s30 = sld [smem:[#allocation34_spill]] }
  0xf0   : > { %1611 = dma.hbm_to_vmem [thread:$0]  (!%p2833_p12), %s2504_s6, 128, %s477_s24, %s2422_s20  }
  0xf4   : > { %p2835_p8 = scmp.ne.s32.totalorder %s2834_s30, 0 }
  0xf5   : > { %s2551_s3 = sand.u32 (!%p2835_p8), 1, %s2085_s25   ;;  %p2836_p7 = scmp.ne.s32.totalorder (!%p2835_p8), %s2811_s28, 0 }
  0xf6   : > { %485 = sbr.rel (%p2835_p8) target bundleno = 1777 (0x6f1), region = 64  ;;  %s2554_s15 = sshll.u32 (!%p2835_p8), %s2551_s3, 3 }
  0xf7   : > { %s488_s11 = scalar_lea.sflag (!%p2835_p8), [#allocation7], %s2551_s3  ;;  %s491_s29 = scalar_lea.vmem (!%p2835_p8), [#allocation6], %s2554_s15 }
  0xfd   : > { %2044 = dma.done.wait (%p2836_p7), %s488_s11, 128  }
  0xfe   : > { %2046 = vsyncadd (%p2836_p7), %s488_s11, 4294967168  ;;  %s496_s10 = sand.u32 1, %s2257_s14   ;;  %s500_s6 = scalar_lea.vmem [#allocation9], %s2554_s15 }
  0xff   : > { %s497_s20 = scalar_lea.sflag [#allocation10], %s496_s10 }
 0x100   : > { %2048 = dma.done.wait (%p2836_p7), %s497_s20, 256  }
 0x101   : > { %2050 = vsyncadd (%p2836_p7), %s497_s20, 4294967040  ;;  %s509_s24 = scalar_lea.vmem [#allocation11], %s2554_s15  ;;  %p2837_p13 = scmp.eq.s32.totalorder %s2257_s14, 0 }
 0x103   : > { %2052 = dma.done.wait (%p2837_p13), [#allocation13], 1024   ;;  %p2838_p10 = pmov %p2837_p13 }
 0x105   : > { %2054 = vsyncadd (%p2838_p10), [#allocation13], 4294966272  ;;  %p2839_p2 = pmov %p2838_p10 }
 0x107   : > { %2056 = dma.done.wait (%p2839_p2), [#allocation16], 528   ;;  %p2840_p6 = pmov %p2839_p2 }
 0x108   : > { %s578_s27 = sand.u32 1, %s2073_s22   ;;  %s573_s21 = scalar_lea.vmem [#allocation18], %s2554_s15 }
 0x109   : > { %2058 = vsyncadd (%p2840_p6), [#allocation16], 4294966768  ;;  %s2580_s28 = sshll.u32 %s578_s27, 3  ;;  %s2841_s16 = sld [smem:[#allocation30_spill]] }
 0x10a   : > { %s580_s17 = scalar_lea.vmem [#allocation19], %s2580_s28 }
 0x10f   : > { %p1440_p9 = scmp.ne.s32.totalorder %s2841_s16, 0 }
 0x110   : > { %v588_v0 = vld [vmem:[#allocation12] sm:$0xff] (!%p1440_p9)  ;;  %v589_v1 = vld [vmem:[#allocation12 + $0x8] sm:$0xff] (!%p1440_p9)  ;;  %v2120_v3 = vmov (!%p1440_p9), 0.0|0.0   ;;  %v590_v6 = vld [vmem:[#allocation12 + $0x10] sm:$0xff] (!%p1440_p9)  ;;  %vm2121_vm0 = vmmov (!%p1440_p9), 0   ;;  %v2122_v9 = vmov (!%p1440_p9), 0.0  }
 0x111   : > { %584 = sbr.rel (%p1440_p9) target bundleno = 628 (0x274), region = 96  ;;  %v673_v2 = vld [vmem:[#allocation14] sm:$0xff] (!%p1440_p9)  ;;  %1539 = vmatprep.subr.bf16.mxu0 (!%p1440_p9), %v2120_v3  ;;  %v1540_v4 = vpack.c.bf16 (!%p1440_p9), %v589_v1, %v588_v0  ;;  %1545 = vmatprep.subr.bf16.mxu1 (!%p1440_p9), %v2120_v3  ;;  %v674_v5 = vld [vmem:[#allocation14 + $0x8] sm:$0xff] (!%p1440_p9)  ;;  %v591_v7 = vld [vmem:[#allocation12 + $0x18] sm:$0xff] (!%p1440_p9)  ;;  %vm599_vm1 = vcmask (!%p1440_p9), 261120   ;;  %s2842_s2 = sld [smem:[#allocation44_spill]] (!%p1440_p9) }
 0x112   : > { %v1546_v8 = vpack.c.bf16 (!%p1440_p9), %v674_v5, %v673_v2  ;;  %1493 = vmatprep.mubr.msk.f32.mxu0 (!%p1440_p9), %vm2121_vm0, %v2122_v9  ;;  %v675_v10 = vld [vmem:[#allocation14 + $0x10] sm:$0xff] (!%p1440_p9)  ;;  %v676_v11 = vld [vmem:[#allocation14 + $0x18] sm:$0xff] (!%p1440_p9)  ;;  %1504 = vmatprep.mubr.msk.f32.mxu1 (!%p1440_p9), %vm2121_vm0, %v2122_v9  ;;  %v1543_v12 = vpack.c.bf16 (!%p1440_p9), %v591_v7, %v590_v6  ;;  %v757_v14 = vld [vmem:[#allocation15] sm:$0xff] (!%p1440_p9)  ;;  %s2843_s18 = sld [smem:[#allocation45_spill]] (!%p1440_p9)  ;;  %vm841_vm2 = vcmask (!%p1440_p9), 64512   ;;  %s2123_s1 = smov (!%p1440_p9), 112  }
 0x113   : > { %1541 = vmatpush3.bf16.msra.mxu0 (!%p1440_p9), %v1540_v4  ;;  %v1549_v13 = vpack.c.bf16 (!%p1440_p9), %v676_v11, %v675_v10  ;;  %v758_v15 = vld [vmem:[#allocation15 + $0x8] sm:$0xff] (!%p1440_p9)  ;;  %v585_v16 = vld [vmem:[%s491_s29] sm:$0xff] (!%p1440_p9)  ;;  %s2124_s30 = smov (!%p1440_p9), 120   ;;  %v1445_v31 = vld [vmem:[#allocation17] ss:$0 sm:$0xff] (!%p1440_p9)  ;;  %s2125_s11 = smov (!%p1440_p9), 104  }
 0x114   : > { %1542 = vmatprep.subr.bf16.mxu0 (!%p1440_p9), %v2120_v3  ;;  %1547 = vmatpush3.bf16.msra.mxu1 (!%p1440_p9), %v1546_v8  ;;  %v1552_v17 = vpack.c.bf16 (!%p1440_p9), %v758_v15, %v757_v14  ;;  %v586_v18 = vld [vmem:[%s500_s6] sm:$0xff] (!%p1440_p9)  ;;  %v759_v19 = vld [vmem:[#allocation15 + $0x10] sm:$0xff] (!%p1440_p9)  ;;  %v760_v20 = vld [vmem:[#allocation15 + $0x18] sm:$0xff] (!%p1440_p9) }
 0x115   : > { %1548 = vmatprep.subr.bf16.mxu1 (!%p1440_p9), %v2120_v3  ;;  %v1555_v21 = vpack.c.bf16 (!%p1440_p9), %v760_v20, %v759_v19  ;;  %v587_v22 = vld [vmem:[%s509_s24] sm:$0xff] (!%p1440_p9) }
 0x117   : > { %1544 = vmatpush3.bf16.msra.mxu0 (!%p1440_p9), %v1543_v12  ;;  %v1441_v23 = vld [vmem:[%s2842_s2] ss:$0 sm:$0xff] (!%p1440_p9) }
 0x118   : > { %1550 = vmatpush3.bf16.msra.mxu1 %v1549_v13  ;;  %1551 = vmatprep.subr.bf16.mxu0 %v2120_v3  ;;  %v1443_v24 = vld [vmem:[%s2843_s18] ss:$0 sm:$0xff] }
 0x11a   : > { %1494 = vmatmul.mubr.msk.f32.vlgmr.msra.gmra.mrb[0].mxu0 %vm599_vm1, %v585_v16 }
 0x11b   : > { %1553 = vmatpush3.bf16.msra.mxu0 %v1552_v17  ;;  %1505 = vmatmul.mubr.msk.f32.vlgmr.msra.gmra.mrb[0].mxu1 %vm599_vm1, %v586_v18 }
 0x11c   : > { %1554 = vmatprep.subr.bf16.mxu0 %v2120_v3  ;;  %1515 = vmatprep.mubr.msk.f32.mxu0 %vm2121_vm0, %v2122_v9 }
 0x11f   : > { %1556 = vmatpush3.bf16.msra.mxu0 %v1555_v21 }
 0x122   : > { %1516 = vmatmul.mubr.msk.f32.vlgmr.msra.gmra.mrb[2].mxu0 %vm599_vm1, %v587_v22 }
 0x1ed   : > { %v669_v25 = vpop.f32.mrb[0].mxu0 }
 0x1ee   : > { %v670_v26 = vadd.f32 %v1441_v23, %v669_v25  ;;  %v1495_v27 = vpop.f32.mrb[1].mxu0  ;;  %v753_v28 = vpop.f32.mrb[0].mxu1 }
 0x1ef   : > { %v754_v29 = vadd.f32 %v1443_v24, %v753_v28  ;;  %v1506_v30 = vpop.f32.mrb[1].mxu1 }
 0x1f0   : > { %842 = vst.msk [vmem:[#allocation2] sm:$0xff] %vm841_vm2, %v670_v26  ;;  %863 = vrot.lane.b32.xlu1 %v670_v26, %s2123_s1  ;;  %846 = vrot.lane.b32.xlu0 %v670_v26, %s2124_s30 }
 0x1f1   : > { %843 = vst.msk [vmem:[#allocation3] sm:$0xff] %vm841_vm2, %v754_v29 }
 0x1f4   : > { %852 = vrot.lane.b32.xlu0 %v754_v29, %s2124_s30 }
 0x1f5   : > { %v837_v32 = vpop.f32.mrb[2].mxu0 }
 0x1f6   : > { %v838_v33 = vadd.f32 %v1445_v31, %v837_v32  ;;  %v1517_v34 = vpop.f32.mrb[3].mxu0 }
 0x1f8   : > { %844 = vst.msk [vmem:[#allocation4] sm:$0xff] %vm841_vm2, %v838_v33  ;;  %868 = vrot.lane.b32.xlu0 %v754_v29, %s2123_s1  ;;  %858 = vrot.lane.b32.xlu1 %v838_v33, %s2124_s30 }
 0x1fc   : > { %878 = vrot.lane.b32.xlu0 %v670_v26, %s2125_s11  ;;  %873 = vrot.lane.b32.xlu1 %v838_v33, %s2123_s1 }
 0x200   : > { %888 = vrot.lane.b32.xlu0 %v838_v33, %s2125_s11  ;;  %883 = vrot.lane.b32.xlu1 %v754_v29, %s2125_s11 }
 0x262   : > { %v864_v35 = vpop.permute.xlu1 %863  ;;  %v847_v36 = vpop.permute.xlu0 %846 }
 0x263   : > { %867 = vst.msk [vmem:[#allocation2 + $0x10] sm:$0xff] %vm841_vm2, %v864_v35  ;;  %850 = vst.msk [vmem:[#allocation2 + $0x8] sm:$0xff] %vm841_vm2, %v847_v36 }
 0x266   : > { %v853_v37 = vpop.permute.xlu0 %852 }
 0x267   : > { %856 = vst.msk [vmem:[#allocation3 + $0x8] sm:$0xff] %vm841_vm2, %v853_v37 }
 0x26a   : > { %v869_v38 = vpop.permute.xlu0 %868  ;;  %v859_v39 = vpop.permute.xlu1 %858 }
 0x26b   : > { %872 = vst.msk [vmem:[#allocation3 + $0x10] sm:$0xff] %vm841_vm2, %v869_v38  ;;  %862 = vst.msk [vmem:[#allocation4 + $0x8] sm:$0xff] %vm841_vm2, %v859_v39 }
 0x26e   : > { %v879_v40 = vpop.permute.xlu0 %878  ;;  %v874_v41 = vpop.permute.xlu1 %873 }
 0x26f   : > { %882 = vst.msk [vmem:[#allocation2 + $0x18] sm:$0xff] %vm841_vm2, %v879_v40  ;;  %877 = vst.msk [vmem:[#allocation4 + $0x10] sm:$0xff] %vm841_vm2, %v874_v41 }
 0x272   : > { %v889_v42 = vpop.permute.xlu0 %888  ;;  %v884_v43 = vpop.permute.xlu1 %883 }
 0x273   : > { %892 = vst.msk [vmem:[#allocation4 + $0x18] sm:$0xff] %vm841_vm2, %v889_v42  ;;  %887 = vst.msk [vmem:[#allocation3 + $0x18] sm:$0xff] %vm841_vm2, %v884_v43 }
 0x274 PF: > { %s2844_s29 = sld [smem:[#allocation30_spill]]  ;;  %vm900_vm3 = vcmask 64512   ;;  %v2126_v44 = vmov 0.0   ;;  %vm2127_vm4 = vmmov 0  }
 0x275   : > { %1518 = vmatprep.subr.mxu0 %v2126_v44  ;;  %1520 = vmatprep.mubr.msk.f32.mxu0 %vm2127_vm4, %v2126_v44 }
 0x276   : > { %1523 = vmatprep.subr.mxu1 %v2126_v44  ;;  %1525 = vmatprep.mubr.msk.f32.mxu1 %vm2127_vm4, %v2126_v44 }
 0x27a   : > { %s2613_s10 = sshll.u32 %s2844_s29, 3  ;;  %p1451_p11 = scmp.ne.s32.totalorder %s2844_s29, 3 }
 0x27b   : > { %s896_s20 = scalar_lea.vmem [#allocation3], %s2613_s10  ;;  %s894_s6 = scalar_lea.vmem [#allocation2], %s2613_s10  ;;  %v2129_v63 = vmov (!%p1451_p11), 0.0|0.0   ;;  %vm2131_vm5 = vmmov (!%p1451_p11), 0   ;;  %v2132_v6 = vmov (!%p1451_p11), 0.0   ;;  %vm1088_vm6 = vcmask (!%p1451_p11), 130048  }
 0x27c   : > { %v897_v45 = vld [vmem:[%s896_s20] sm:$0xff]  ;;  %s898_s24 = scalar_lea.vmem [#allocation4], %s2613_s10  ;;  %s1061_s16 = scalar_lea.vmem [#allocation5], %s2613_s10  ;;  %vm1090_vm7 = vcmask (!%p1451_p11), 195584   ;;  %vm1103_vm8 = vcmask (!%p1451_p11), 261120  }
 0x27d   : > { %1519 = vmatpush3.xpose.msk.msra.mxu0 %vm900_vm3, %v897_v45  ;;  %v895_v46 = vld [vmem:[%s894_s6] sm:$0xff]  ;;  %s2128_s14 = smov (!%p1451_p11), 8   ;;  %s2845_s9 = sld [smem:[#allocation47_spill]] (!%p1451_p11) }
 0x27e   : > { %v899_v55 = vld [vmem:[%s898_s24] sm:$0xff]  ;;  %1557 = vmatprep.subr.bf16.mxu0 (!%p1451_p11), %v2129_v63  ;;  %s2130_s1 = smov (!%p1451_p11), 24   ;;  %s2133_s20 = smov (!%p1451_p11), 16  }
 0x27f   : > { %1524 = vmatpush3.msra.mxu1 %v899_v55 }
 0x280   : > { %1521 = vmatmul.mubr.msk.f32.vlgmr.msra.gmra.mrb[0].mxu0 %vm900_vm3, %v895_v46 }
 0x281   : > { %1536 = vmatprep.mubr.msk.f32.mxu0 (!%p1451_p11), %vm2131_vm5, %v2132_v6 }
 0x283   : > { %v1092_v0 = vld [vmem:[%s2845_s9] sm:$0xff] (!%p1451_p11)  ;;  %v1093_v1 = vld [vmem:[%s2845_s9 + $0x8] sm:$0xff] (!%p1451_p11)  ;;  %v1094_v4 = vld [vmem:[%s2845_s9 + $0x10] sm:$0xff] (!%p1451_p11) }
 0x284   : > { %v1558_v3 = vpack.c.bf16 (!%p1451_p11), %v1093_v1, %v1092_v0  ;;  %v1095_v5 = vld [vmem:[%s2845_s9 + $0x18] sm:$0xff] (!%p1451_p11) }
 0x285   : > { %v1561_v7 = vpack.c.bf16 (!%p1451_p11), %v1095_v5, %v1094_v4 }
 0x286   : > { %1559 = vmatpush3.bf16.msra.mxu0 (!%p1451_p11), %v1558_v3 }
 0x287   : > { %1560 = vmatprep.subr.bf16.mxu0 (!%p1451_p11), %v2129_v63 }
 0x28a   : > { %1562 = vmatpush3.bf16.msra.mxu0 (!%p1451_p11), %v1561_v7 }
 0x353   : > { %v973_v47 = vpop.f32.mrb[0].mxu0 }
 0x354   : > { %v1522_v48 = vpop.f32.mrb[1].mxu0  ;;  %v977_v49 = vsel %vm900_vm3, %v973_v47, -inf }
 0x355   : > { %978 = vmax.xlane.f32.xlu0 %v977_v49 }
 0x3e2   : > { %v979_v50 = vpop.xlane.xlu0 %978 }
 0x3e3   : > { %v980_v51 = vsub.f32 %v973_v47, %v979_v50 }
 0x3e5   : > { %v981_v52 = vmul.f32 1.442695, %v980_v51 }
 0x3e7   : > { %1737 = vpow2.f32 %v981_v52 }
 0x3f1   : > { %v1738_v53 = vpop.eup %1737 }
 0x3f2   : > { %v983_v54 = vsel %vm900_vm3, %v1738_v53, 0.0 }
 0x3f3   : > { %984 = vadd.xlane.f32.xlu0 %v983_v54 }
 0x480   : > { %v985_v56 = vpop.xlane.xlu0 %984 }
 0x481   : > { %1739 = vrcp.f32 %v985_v56 }
 0x48b   : > { %v1740_v57 = vpop.eup %1739 }
 0x48c   : > { %v987_v58 = vmul.f32 %v1740_v57, %v1738_v53 }
 0x48e   : > { %1526 = vmatmul.mubr.msk.f32.vlgmr.msra.gmra.mrb[0].mxu1 %vm900_vm3, %v987_v58  ;;  %1063 = vst.msk [vmem:[%s580_s17] sm:$0xff] %vm900_vm3, %v987_v58 }
 0x55c   : > { %1067 = sbr.rel (%p1451_p11) target bundleno = 1722 (0x6ba), region = 100 }
 0x561   : > { %v1057_v59 = vpop.f32.mrb[0].mxu1 }
 0x562   : > { %1062 = vst.msk [vmem:[%s1061_s16] sm:$0xff] %vm900_vm3, %v1057_v59  ;;  %v1527_v60 = vpop.f32.mrb[1].mxu1  ;;  %s2846_s16 = sld [smem:[#allocation48_spill]] (!%p1451_p11) }
 0x568   : > { %v1452_v15 = vld [vmem:[%s2846_s16] ss:$0 sm:$0xff] }
 0x569   : > { %v1070_v61 = vld [vmem:[#allocation5 + $0x8] sm:$0xff]  ;;  %v1074_v62 = vld [vmem:[#allocation5 + $0x18] sm:$0xff]  ;;  %v1072_v2 = vld [vmem:[#allocation5 + $0x10] sm:$0xff] }
 0x56a   : > { %1076 = vrot.lane.b32.xlu0 %v1070_v61, %s2128_s14  ;;  %1084 = vrot.lane.b32.xlu1 %v1074_v62, %s2130_s1  ;;  %v1068_v9 = vld [vmem:[#allocation5] sm:$0xff] }
 0x56e   : > { %1080 = vrot.lane.b32.xlu0 %v1072_v2, %s2133_s20 }
 0x5dc   : > { %v1077_v8 = vpop.permute.xlu0 %1076  ;;  %v1085_v10 = vpop.permute.xlu1 %1084 }
 0x5dd   : > { %v1087_v11 = vsel %vm900_vm3, %v1068_v9, %v1077_v8 }
 0x5e0   : > { %v1081_v12 = vpop.permute.xlu0 %1080 }
 0x5e1   : > { %v1089_v13 = vsel %vm1088_vm6, %v1087_v11, %v1081_v12 }
 0x5e2   : > { %v1091_v14 = vsel %vm1090_vm7, %v1089_v13, %v1085_v10 }
 0x5e3   : > { %1537 = vmatmul.mubr.msk.f32.vlgmr.msra.gmra.mrb[0].mxu0 %vm1103_vm8, %v1091_v14 }
 0x6b6   : > { %v1173_v16 = vpop.f32.mrb[0].mxu0 }
 0x6b7   : > { %v1174_v17 = vadd.f32 %v1452_v15, %v1173_v16  ;;  %v1538_v18 = vpop.f32.mrb[1].mxu0 }
 0x6b9   : > { %1177 = vst.msk [vmem:[%s573_s21] sm:$0xff] %vm1103_vm8, %v1174_v17 }
 0x6ba PF: > { %s2847_s14 = sld [smem:[#allocation31_spill]]  ;;  %s2848_s18 = sld [smem:[#allocation49_spill]] }
 0x6bb   : > { %s1197_s30 = sshll.u32 %s573_s21, 4  ;;  %s1179_s11 = scalar_lea.sflag [#allocation8], %s2551_s3  ;;  %s1198_s30 = int_to_ptr.vmem [resolvable:$true] %s1197_s30 }
 0x6bc   : > { %s1943_s29 = scalar_lea.vmem %s1198_s30, 128  ;;  %p2849_p4 = scmp.ne.s32.totalorder %s2813_s19, 0 }
 0x6bd   : > { %p1944_p5 = scmp.ne.s32.totalorder %s1198_s30, %s1943_s29  ;;  %s2134_s10 = smov [#allocation18]  }
 0x6be   : > { %s1947_s20 = sshll.u32 %s2134_s10, 4  ;;  %s1948_s20 = int_to_ptr.vmem [resolvable:$false] %s1947_s20 }
 0x6bf   : > { %p1945_p0 = pnand %p1944_p5, %p2849_p4  ;;  %s1949_s6 = scalar_lea.vmem %s1948_s20, 256 }
 0x6c0   : > { %s1456_s4 = sshll.u32 %s2847_s14, 7  ;;  %p1950_p3 = scmp.lt.s32.totalorder %s1198_s30, %s1948_s20 }
 0x6c1   : > { %s2651_s1 = scalar_lea.hbm %s2848_s18, %s1456_s4  ;;  %p1946_p1 = pneg %p1945_p0 }
 0x6c2   : > { %p1951_p12 = scmp.lt.s32.totalorder %s1949_s6, %s1943_s29 }
 0x6c4   : > { %p1952_p8 = por %p1951_p12, %p1950_p3 }
 0x6c6   : > { %p1953_p7 = pnand %p1952_p8, %p1946_p1 }
 0x6c8   : > { %1956 = shalt.err (!%p1953_p7)
}
 0x6c9   : > { %s1957_s3 = scalar_lea.hbm %s2651_s1, 128  ;;  %s1961_s24 = scalar_lea.hbm %s2848_s18, 256 }
 0x6ca   : > { %p1958_p13 = scmp.ne.s32.totalorder %s2651_s1, %s1957_s3  ;;  %p1962_p6 = scmp.lt.u32.totalorder %s2651_s1, %s2848_s18 }
 0x6cb   : > { %p1963_p9 = scmp.lt.u32.totalorder %s1961_s24, %s1957_s3  ;;  %p1965_p5 = scmp.lt.u32.totalorder %s1957_s3, %s2651_s1 }
 0x6cc   : > { %p1959_p10 = pnand %p1958_p13, %p2849_p4 }
 0x6cd   : > { %p1964_p11 = por %p1963_p9, %p1962_p6 }
 0x6ce   : > { %p1960_p2 = pneg %p1959_p10 }
 0x6cf   : > { %p1966_p0 = por %p1965_p5, %p1964_p11 }
 0x6d1   : > { %p1967_p1 = pnand %p1966_p0, %p1960_p2 }
 0x6d3   : > { %1970 = shalt.err (!%p1967_p1)
}
 0x6d4   : > { %s2850_s2 = sld [smem:[#allocation30_spill]]  ;;  %s1457_s23 = sshll.u32 %s2847_s14, 2 }
 0x6d5   : > { %1585 = dma.vmem_to_hbm [thread:$0]  (%p2849_p4), %s1198_s30, 128, %s2651_s1, %s1179_s11  }
 0x6d6   : > { %s1212_s29 = sshll.u32 %s580_s17, 4  ;;  %s2851_s19 = sld [smem:[#allocation50_spill]]  ;;  %s2677_s29 = int_to_ptr.vmem [resolvable:$true] %s1212_s29 }
 0x6d7   : > { %s1184_s21 = scalar_lea.sflag [#allocation20], %s578_s27  ;;  %s1971_s24 = scalar_lea.vmem %s2677_s29, 128 }
 0x6d8   : > { %p1972_p3 = scmp.ne.s32.totalorder %s2677_s29, %s1971_s24  ;;  %p2852_p12 = scmp.ne.s32.totalorder %s2819_s7, 0 }
 0x6d9   : > { %s2135_s28 = smov [#allocation19]  }
 0x6da   : > { %s1208_s10 = sadd.s32 %s2850_s2, %s1457_s23  ;;  %p1973_p4 = pnand %p1972_p3, %p2852_p12 }
 0x6db   : > { %s1458_s20 = sshll.u32 %s1208_s10, 7  ;;  %s1975_s17 = sshll.u32 %s2135_s28, 4  ;;  %s1976_s17 = int_to_ptr.vmem [resolvable:$false] %s1975_s17 }
 0x6dc   : > { %s1210_s15 = scalar_lea.hbm %s2851_s19, %s1458_s20  ;;  %p1974_p8 = pneg %p1973_p4 }
 0x6dd   : > { %s1977_s14 = scalar_lea.vmem %s1976_s17, 256  ;;  %p1978_p7 = scmp.lt.s32.totalorder %s2677_s29, %s1976_s17 }
 0x6de   : > { %p1979_p13 = scmp.lt.s32.totalorder %s1977_s14, %s1971_s24 }
 0x6e0   : > { %p1980_p10 = por %p1979_p13, %p1978_p7 }
 0x6e2   : > { %p1981_p2 = pnand %p1980_p10, %p1974_p8 }
 0x6e4   : > { %1984 = shalt.err (!%p1981_p2)
}
 0x6e5   : > { %s1985_s1 = scalar_lea.hbm %s1210_s15, 128  ;;  %s1989_s11 = scalar_lea.hbm %s2851_s19, 1024 }
 0x6e6   : > { %p1986_p6 = scmp.ne.s32.totalorder %s1210_s15, %s1985_s1  ;;  %p1990_p5 = scmp.lt.u32.totalorder %s1210_s15, %s2851_s19 }
 0x6e7   : > { %p1991_p0 = scmp.lt.u32.totalorder %s1989_s11, %s1985_s1  ;;  %p1993_p3 = scmp.lt.u32.totalorder %s1985_s1, %s1210_s15 }
 0x6e8   : > { %p1987_p9 = pnand %p1986_p6, %p2852_p12 }
 0x6e9   : > { %p1992_p1 = por %p1991_p0, %p1990_p5 }
 0x6ea   : > { %p1988_p11 = pneg %p1987_p9 }
 0x6eb   : > { %p1994_p4 = por %p1993_p3, %p1992_p1 }
 0x6ed   : > { %p1995_p8 = pnand %p1994_p4, %p1988_p11 }
 0x6ef   : > { %1998 = shalt.err (!%p1995_p8)
}
 0x6f0   : > { %1586 = dma.vmem_to_hbm [thread:$0]  (%p2852_p12), %s2677_s29, 128, %s1210_s15, %s1184_s21  }
 0x6f1 PF: > { %s2853_s2 = sld [smem:[#allocation29_spill]]  ;;  %s2854_s23 = sld [smem:[#allocation37_spill]] }
 0x6f2   : > { %p1628_p7 = scmp.ge.s32.totalorder %s2109_s13, 2 }
 0x6f7   : > { %s1224_s10 = sand.u32 1, %s2853_s2   ;;  %p2855_p13 = scmp.ne.s32.totalorder %s2854_s23, 0 }
 0x6f8   : > { %s1225_s20 = scalar_lea.sflag [#allocation8], %s1224_s10 }
 0x6f9   : > { %p1613_p10 = pnand %p1628_p7, %p2855_p13 }
 0x6fb   : > { %2060 = dma.done.wait (!%p1613_p10), %s1225_s20, 128  }
 0x6fc   : > { %2062 = vsyncadd (!%p1613_p10), %s1225_s20, 4294967168  ;;  %s2856_s6 = sld [smem:[#allocation27_spill]]  ;;  %s2857_s3 = sld [smem:[#allocation40_spill]] }
 0x702   : > { %s1233_s24 = sand.u32 1, %s2856_s6   ;;  %p2858_p2 = scmp.ne.s32.totalorder %s2857_s3, 0 }
 0x703   : > { %s1234_s28 = scalar_lea.sflag [#allocation20], %s1233_s24 }
 0x704   : > { %p1616_p6 = pnand %p1628_p7, %p2858_p2 }
 0x706   : > { %2064 = dma.done.wait (!%p1616_p6), %s1234_s28, 128  }
 0x707   : > { %2066 = vsyncadd (!%p1616_p6), %s1234_s28, 4294967168  ;;  %s37_s13 = sadd.s32 1, %s2109_s13   ;;  %s2859_s7 = sld [smem:[#allocation28_spill]] }
 0x708   : > { %p34_p12 = scmp.ge.s32.totalorder %s37_s13, 10   ;;  %s2860_s23 = sld [smem:[#allocation39_spill]] }
 0x709   : > { %s2861_s29 = sld [smem:[#allocation38_spill]]  ;;  %s2862_s27 = sld [smem:[#allocation32_spill]] }
 0x70a   : > { %s2863_s28 = sld [smem:[#allocation33_spill]]  ;;  %s2864_s15 = sld [smem:[#allocation35_spill]] }
 0x70b   : > { %s2865_s30 = sld [smem:[#allocation36_spill]]  ;;  %s2866_s21 = smov %s2073_s22 }
 0x70c   : > { %s2868_s24 = smov %s2085_s25  ;;  %s2869_s25 = smov %s2089_s26 }
 0x70d   : > { %s2867_s22 = smov %s2859_s7  ;;  %36 = sbr.rel (!%p34_p12) target bundleno = 26 (0x1a), region = 190 }
 0x70f   : > { %s2870_s26 = smov %s2861_s29 }
 0x710   : > { %s2871_s29 = smov %s2864_s15 }
 0x714   :  { %1239 = vsyncpa [#allocation7], 1 }
 0x715   :  { %1241 = vsyncpa [#allocation7 + $0x1], 1 }
 0x716   :  { %1242 = vsyncpa [#allocation10], 1 }
 0x717   :  { %1244 = vsyncpa [#allocation10 + $0x1], 1 }
 0x718   :  { %1245 = vsyncpa [#allocation13], 1 }
 0x719   :  { %1246 = vsyncpa [#allocation16], 1 }
 0x71a   :  { %1247 = vsyncpa [#allocation8], 1 }
 0x71b   :  { %1249 = vsyncpa [#allocation8 + $0x1], 1 }
 0x71c   :  { %1250 = vsyncpa [#allocation20], 1 }
 0x71d   :  { %1252 = vsyncpa [#allocation20 + $0x1], 1 }

</bundles_post_ra>
